<compile_context>
chip_gen: v6e
topology: v6e:2x2x1
jax: 0.10.0
libtpu: 0.0.40
codegen_flags: <defaults>
</compile_context>

<pallas_src>
import math
import jax
import jax.numpy as jnp
from jax import lax
from jax.experimental import pallas as pl
from jax.experimental.pallas import tpu as pltpu

# ----- small, self-consistent config (scaled-down ViT, same structure) -----
IMAGE_SIZE = (32, 32)
PATCH = 16
CHANNELS = 3
D_MODEL = 128
D_FF = 256
N_HEADS = 4
HEAD_DIM = D_MODEL // N_HEADS
N_LAYERS = 2
N_CLS = 11
BATCH = 2

GRID_H = IMAGE_SIZE[0] // PATCH
GRID_W = IMAGE_SIZE[1] // PATCH
N_PATCH = GRID_H * GRID_W
SEQ = N_PATCH + 1                    # +1 cls token (not distilled)
S_PAD = 8                            # SEQ padded to a sublane multiple
PATCH_DIM = CHANNELS * PATCH * PATCH
N_CLS_PAD = 128                      # lane-dense logits (sliced to N_CLS outside)
EPS = 1e-5
NEG_INF = -1e9

# Batch packing: TB images per grid batch-tile, packed into matmul M rows.
# (For production sizes pick TB so TB*S_PAD ~ 128 on v5e / 256 on v6e/v7x.)
TB = BATCH
assert TB & (TB - 1) == 0, "TB must be a power of two (mask uses bit ops)"
TB_SHIFT = TB.bit_length() - 1
M_TILE = TB * S_PAD                  # rows per grid step (= 16 here)

W_IN_COLS = 3 * D_MODEL + D_MODEL + D_FF   # [ Wqkv | Wo | W1 ] packed slab
SLAB_W = max(3 * D_MODEL, D_FF)            # per-layer bias/LN slab width
FINAL_W = max(D_MODEL, N_CLS_PAD)          # final norm/head-bias slab width


# ---------------------------------------------------------------------------
# Helpers
# ---------------------------------------------------------------------------
def _layernorm(x, w, b):
    # one-pass variance: E[x^2] - E[x]^2 (two independent cross-lane reduces)
    m = jnp.mean(x, axis=-1, keepdims=True)
    m2 = jnp.mean(x * x, axis=-1, keepdims=True)
    var = m2 - m * m
    return (x - m) * lax.rsqrt(var + EPS) * w + b


# ---------------------------------------------------------------------------
# Fused ViT kernel
# ---------------------------------------------------------------------------
def vit_kernel(patches_ref, tok0_ref, pe_w_ref,
               w_in_ref, w2_ref, bias_ref,
               final_ref, head_w_ref,
               o_ref, x_vmem):
    l = pl.program_id(1)

    # ---- layer 0 only: patch embedding + cls token + positional embedding ----
    @pl.when(l == 0)
    def _init():
        emb = jnp.dot(patches_ref[...], pe_w_ref[...],
                      preferred_element_type=jnp.float32)        # [M_TILE, D]
        # tok0 already carries cls+pos (seq-0 rows), pos+conv-bias (patch
        # rows) and zeros (padding rows); padded patch rows multiply to zero.
        x_vmem[...] = tok0_ref[...] + emb

    # ---- one transformer block (this layer's weights resident in VMEM) ----
    x = x_vmem[...]                                              # [M_TILE, D] f32
    xb = x.astype(jnp.bfloat16)

    w_in = w_in_ref[...]                                         # [D, 3D+D+D_FF] bf16
    wqkv = w_in[:, :3 * D_MODEL]
    wo = w_in[:, 3 * D_MODEL:4 * D_MODEL]
    w1 = w_in[:, 4 * D_MODEL:4 * D_MODEL + D_FF]

    bias = bias_ref[...]                                         # [8, SLAB_W] f32
    bqkv = bias[0:1, :3 * D_MODEL]
    bo = bias[1:2, :D_MODEL]
    ln1w = bias[2:3, :D_MODEL]
    ln1b = bias[3:4, :D_MODEL]
    b1 = bias[4:5, :D_FF]
    b2 = bias[5:6, :D_MODEL]
    ln2w = bias[6:7, :D_MODEL]
    ln2b = bias[7:8, :D_MODEL]

    # fused QKV projection: one [M_TILE,128] x [128,384] MXU push
    qkv = (jnp.dot(xb, wqkv, preferred_element_type=jnp.float32)
           + bqkv).astype(jnp.bfloat16)                          # [M_TILE, 3D]

    # attention mask over the packed batch: key must belong to the same image
    # (row % TB == col % TB) and be a real (non-padded) token (col // TB < SEQ).
    row = lax.broadcasted_iota(jnp.int32, (M_TILE, M_TILE), 0)
    col = lax.broadcasted_iota(jnp.int32, (M_TILE, M_TILE), 1)
    same_img = (row & (TB - 1)) == (col & (TB - 1))
    valid_key = (col >> TB_SHIFT) < SEQ
    mask = jnp.where(same_img & valid_key,
                     jnp.float32(0.0), jnp.float32(NEG_INF))

    scale = 1.0 / math.sqrt(HEAD_DIM)
    attn = jnp.zeros((M_TILE, D_MODEL), jnp.float32)
    for h in range(N_HEADS):          # static unroll; no transpose, no concat
        lo = h * HEAD_DIM
        qh = qkv[:, lo:lo + HEAD_DIM]
        kh = qkv[:, D_MODEL + lo:D_MODEL + lo + HEAD_DIM]
        vh = qkv[:, 2 * D_MODEL + lo:2 * D_MODEL + lo + HEAD_DIM]
        # contract last dims -> q @ k^T without materializing a transpose
        s = lax.dot_general(qh, kh, (((1,), (1,)), ((), ())),
                            preferred_element_type=jnp.float32) * scale
        s = s + mask
        s = s - jnp.max(s, axis=-1, keepdims=True)
        p = jnp.exp(s)
        p = p * pl.reciprocal(jnp.sum(p, axis=-1, keepdims=True), approx=True)
        oh = jnp.dot(p.astype(jnp.bfloat16), vh,
                     preferred_element_type=jnp.float32)          # [M_TILE, HD]
        # fold the head output straight into W_O's matching row-block and
        # accumulate in registers (no VMEM round-trip, no lane placement).
        attn = attn + jnp.dot(oh.astype(jnp.bfloat16),
                              wo[lo:lo + HEAD_DIM, :],
                              preferred_element_type=jnp.float32)

    x = _layernorm(x + attn + bo, ln1w, ln1b)                    # post-norm Block

    h1 = jnp.maximum(
        jnp.dot(x.astype(jnp.bfloat16), w1,
                preferred_element_type=jnp.float32) + b1, 0.0)
    ff = jnp.dot(h1.astype(jnp.bfloat16), w2_ref[...],
                 preferred_element_type=jnp.float32) + b2
    x = _layernorm(x + ff, ln2w, ln2b)
    x_vmem[...] = x
    # NOTE: padded seq rows become nonzero after the first block; harmless -
    # only the cls rows (rows 0..TB-1) are ever read for the logits.

    # ---- last layer only: final LayerNorm + head on the cls rows only ----
    @pl.when(l == pl.num_programs(1) - 1)
    def _final():
        cls = x[0:TB, :]                      # interleaved packing => cls rows lead
        f = final_ref[...]
        xn = _layernorm(cls, f[0:1, :D_MODEL], f[1:2, :D_MODEL])
        # lane-dense logits (lanes >= N_CLS are zero, sliced in the wrapper)
        o_ref[...] = (jnp.dot(xn.astype(jnp.bfloat16), head_w_ref[...],
                              preferred_element_type=jnp.float32)
                      + f[2:3, :N_CLS_PAD])


# ---------------------------------------------------------------------------
# Wrapper
# ---------------------------------------------------------------------------
def extract_patches(im):
    # NCHW -> [B, S_PAD, C*PS*PS]; per-patch ordering (c, ph, pw) matches the
    # Conv2d weight reshape.  Row 0 (cls slot) and tail rows are zero.
    B = im.shape[0]
    nb = B // TB
    x = im.reshape(B, CHANNELS, GRID_H, PATCH, GRID_W, PATCH)
    x = x.transpose(0, 2, 4, 1, 3, 5).reshape(B, N_PATCH, PATCH_DIM)
    x = jnp.pad(x, ((0, 0), (1, S_PAD - SEQ), (0, 0)))     # [B, S_PAD, PATCH_DIM]
    # tile-interleaved packing: within a batch tile, packed row i holds
    # (seq = i // TB, image = i % TB) -> cls rows land at rows 0..TB-1.
    x = x.reshape(nb, TB, S_PAD, PATCH_DIM).transpose(0, 2, 1, 3)
    return x.reshape(nb * M_TILE, PATCH_DIM).astype(jnp.bfloat16)   # bf16 in wrapper


def vit_forward(im, params):
    B = im.shape[0]
    assert B % TB == 0
    nb = B // TB
    # out block (TB, N_CLS_PAD) must equal full dims or be (8,128)-divisible:
    assert nb == 1 or TB % 8 == 0

    patches = extract_patches(im)                          # [nb*M_TILE, PATCH_DIM] bf16
    tok0 = jnp.repeat(params['tok0'], TB, axis=0)          # [M_TILE, D] f32 (seq=i//TB)

    in_specs = [
        pl.BlockSpec((M_TILE, PATCH_DIM), lambda bt, l: (bt, 0)),       # patches
        pl.BlockSpec((M_TILE, D_MODEL), lambda bt, l: (0, 0)),          # tok0 (shared)
        pl.BlockSpec((PATCH_DIM, D_MODEL), lambda bt, l: (0, 0)),       # pe_w (shared)
        pl.BlockSpec((None, D_MODEL, W_IN_COLS), lambda bt, l: (l, 0, 0)),  # Wqkv|Wo|W1
        pl.BlockSpec((None, D_FF, D_MODEL), lambda bt, l: (l, 0, 0)),       # W2
        pl.BlockSpec((None, 8, SLAB_W), lambda bt, l: (l, 0, 0)),           # bias/LN slab
        pl.BlockSpec((8, FINAL_W), lambda bt, l: (0, 0)),               # final norm/head_b
        pl.BlockSpec((D_MODEL, N_CLS_PAD), lambda bt, l: (0, 0)),       # head_w
    ]

    # TODO(synk): at production ViT sizes set
    # pltpu.CompilerParams(vmem_limit_bytes=...) explicitly (v7x has 64 MiB
    # VMEM) and consider loading pe_w only at l==0 via a manual DMA.
    out = pl.pallas_call(
        vit_kernel,
        out_shape=jax.ShapeDtypeStruct((B, N_CLS_PAD), jnp.float32),
        grid=(nb, N_LAYERS),
        in_specs=in_specs,
        out_specs=pl.BlockSpec((TB, N_CLS_PAD), lambda bt, l: (bt, 0)),
        scratch_shapes=[pltpu.VMEM((M_TILE, D_MODEL), jnp.float32)],   # x carry
        compiler_params=pltpu.CompilerParams(
            dimension_semantics=("parallel", "arbitrary")),
    )(patches, tok0, params['pe_w'], params['w_in'], params['w2'],
      params['bias'], params['final'], params['head_w'])
    return out[:, :N_CLS]


# ---------------------------------------------------------------------------
# Parameter init (deterministic; mirrors init_weights / trunc_normal_ std=0.02)
# ---------------------------------------------------------------------------
def make_params(key):
    keys = iter(jax.random.split(key, 64))

    def nrm(shape, std=0.02):
        return jax.random.normal(next(keys), shape, jnp.float32) * std

    # PatchEmbedding: Conv2d(C, D, kernel=stride=PATCH) rewritten as a matmul
    conv_w = nrm((D_MODEL, CHANNELS, PATCH, PATCH))        # torch [out, in, kh, kw]
    pe_w = conv_w.reshape(D_MODEL, PATCH_DIM).T            # [C*PS*PS, D]
    pe_b = jnp.zeros((D_MODEL,), jnp.float32)              # init_weights: bias = 0

    cls_tok = nrm((1, D_MODEL))
    pos = nrm((SEQ, D_MODEL))
    # fold cls token, positional embedding and conv bias into one init slab
    tok0 = jnp.zeros((S_PAD, D_MODEL), jnp.float32)
    tok0 = tok0.at[0].set(cls_tok[0] + pos[0])
    tok0 = tok0.at[1:SEQ].set(pos[1:] + pe_b)

    w_in_layers, w2_layers, bias_layers = [], [], []
    for _ in range(N_LAYERS):
        wq = nrm((D_MODEL, D_MODEL)).T                     # torch [out,in] -> [in,out]
        wk = nrm((D_MODEL, D_MODEL)).T
        wv = nrm((D_MODEL, D_MODEL)).T
        wo = nrm((D_MODEL, D_MODEL)).T
        w1 = nrm((D_FF, D_MODEL)).T                        # [D, D_FF]
        w2 = nrm((D_MODEL, D_FF)).T                        # [D_FF, D]
        w_in_layers.append(jnp.concatenate([wq, wk, wv, wo, w1], axis=1))
        w2_layers.append(w2)
        # bias/LN slab rows: 0 bqkv | 1 bo | 2 ln1w | 3 ln1b | 4 b1 | 5 b2 | 6 ln2w | 7 ln2b
        slab = jnp.zeros((8, SLAB_W), jnp.float32)
        slab = slab.at[2, :D_MODEL].set(1.0)               # ln1 weight = 1
        slab = slab.at[6, :D_MODEL].set(1.0)               # ln2 weight = 1
        bias_layers.append(slab)

    head_w = nrm((N_CLS, D_MODEL)).T                       # [D, n_cls]
    head_w_pad = jnp.zeros((D_MODEL, N_CLS_PAD),
                           jnp.float32).at[:, :N_CLS].set(head_w)

    # final slab rows: 0 norm weight | 1 norm bias | 2 head bias
    final_slab = jnp.zeros((8, FINAL_W), jnp.float32)
    final_slab = final_slab.at[0, :D_MODEL].set(1.0)

    return dict(
        pe_w=pe_w.astype(jnp.bfloat16),
        tok0=tok0,
        w_in=jnp.stack(w_in_layers).astype(jnp.bfloat16),  # [L, D, 3D+D+D_FF]
        w2=jnp.stack(w2_layers).astype(jnp.bfloat16),      # [L, D_FF, D]
        bias=jnp.stack(bias_layers),                       # [L, 8, SLAB_W] f32
        final=final_slab,                                  # [8, FINAL_W] f32
        head_w=head_w_pad.astype(jnp.bfloat16),
    )


if __name__ == "__main__":
    key = jax.random.PRNGKey(0)
    pkey, xkey = jax.random.split(key)
    params = make_params(pkey)
    im = jax.random.normal(
        xkey, (BATCH, CHANNELS, IMAGE_SIZE[0], IMAGE_SIZE[1]), jnp.float32)
    # TODO(synk): resize_pos_embed path (input size != pos_embed grid) not implemented.
    logits = vit_forward(im, params)
    jax.block_until_ready(logits)
    assert logits.shape == (BATCH, N_CLS)
    print("KERNEL_OK")
</pallas_src>

<mosaic_0001>
module attributes {stable_mosaic.version = 11 : i64} {
  func.func @vit_kernel(%arg0: i32, %arg1: i32, %arg2: memref<16x768xbf16, #tpu.memory_space<vmem>>, %arg3: memref<16x128xf32, #tpu.memory_space<vmem>>, %arg4: memref<768x128xbf16, #tpu.memory_space<vmem>>, %arg5: memref<1x128x768xbf16, #tpu.memory_space<vmem>>, %arg6: memref<1x256x128xbf16, #tpu.memory_space<vmem>>, %arg7: memref<1x8x384xf32, #tpu.memory_space<vmem>>, %arg8: memref<8x128xf32, #tpu.memory_space<vmem>>, %arg9: memref<128x128xbf16, #tpu.memory_space<vmem>>, %arg10: memref<2x128xf32, #tpu.memory_space<vmem>>, %arg11: memref<16x128xf32, #tpu.memory_space<vmem>>) attributes {dimension_semantics = [#tpu.dimension_semantics<parallel>, #tpu.dimension_semantics<arbitrary>], iteration_bounds = array<i64: 1, 2>, scalar_prefetch = 0 : i64, scratch_operands = 1 : i64, tpu.core_type = #tpu.core_type<tc>, window_params = [{transform_indices = @transform_0, window_bounds = array<i64: 16, 768>}, {pipeline_mode = #tpu.pipeline_mode<synchronous>, transform_indices = @transform_1, window_bounds = array<i64: 16, 128>}, {pipeline_mode = #tpu.pipeline_mode<synchronous>, transform_indices = @transform_2, window_bounds = array<i64: 768, 128>}, {transform_indices = @transform_3, window_bounds = array<i64: 1, 128, 768>}, {transform_indices = @transform_4, window_bounds = array<i64: 1, 256, 128>}, {transform_indices = @transform_5, window_bounds = array<i64: 1, 8, 384>}, {pipeline_mode = #tpu.pipeline_mode<synchronous>, transform_indices = @transform_6, window_bounds = array<i64: 8, 128>}, {pipeline_mode = #tpu.pipeline_mode<synchronous>, transform_indices = @transform_7, window_bounds = array<i64: 128, 128>}, {transform_indices = @transform_8, window_bounds = array<i64: 2, 128>}]} {
    %c0_i32 = arith.constant 0 : i32
    %0 = arith.cmpi eq, %arg1, %c0_i32 : i32
    %1 = arith.extui %0 : i1 to i32
    %c0_i32_0 = arith.constant 0 : i32
    %2 = arith.cmpi ne, %1, %c0_i32_0 : i32
    scf.if %2 {
      %c0_57 = arith.constant 0 : index
      %c0_58 = arith.constant 0 : index
      %196 = vector.load %arg2[%c0_57, %c0_58] : memref<16x768xbf16, #tpu.memory_space<vmem>>, vector<16x768xbf16>
      %c0_59 = arith.constant 0 : index
      %c0_60 = arith.constant 0 : index
      %197 = vector.load %arg4[%c0_59, %c0_60] : memref<768x128xbf16, #tpu.memory_space<vmem>>, vector<768x128xbf16>
      %cst_61 = arith.constant dense<0.000000e+00> : vector<16x128xf32>
      %198 = tpu.matmul %196, %197, %cst_61 {dimension_numbers = #tpu.dot_dimension_numbers<[1], [0], [0], [1], [0, 0, 1, 1], [], []>} : vector<16x768xbf16>, vector<768x128xbf16>, vector<16x128xf32> -> vector<16x128xf32>
      %c0_62 = arith.constant 0 : index
      %c0_63 = arith.constant 0 : index
      %199 = vector.load %arg3[%c0_62, %c0_63] : memref<16x128xf32, #tpu.memory_space<vmem>>, vector<16x128xf32>
      %200 = arith.addf %199, %198 : vector<16x128xf32>
      %c0_64 = arith.constant 0 : index
      %c0_65 = arith.constant 0 : index
      %201 = vector.load %arg11[%c0_64, %c0_65] : memref<16x128xf32, #tpu.memory_space<vmem>>, vector<16x128xf32>
      tpu.vector_store %arg11[%c0_64, %c0_65], %200 {strides = array<i32>} : memref<16x128xf32, #tpu.memory_space<vmem>>, vector<16x128xf32>,
    } else {
    }
    %c0 = arith.constant 0 : index
    %c0_1 = arith.constant 0 : index
    %3 = vector.load %arg11[%c0, %c0_1] : memref<16x128xf32, #tpu.memory_space<vmem>>, vector<16x128xf32>
    %4 = arith.truncf %3 : vector<16x128xf32> to vector<16x128xbf16>
    %c0_2 = arith.constant 0 : index
    %c0_3 = arith.constant 0 : index
    %c0_4 = arith.constant 0 : index
    %5 = vector.load %arg5[%c0_2, %c0_3, %c0_4] : memref<1x128x768xbf16, #tpu.memory_space<vmem>>, vector<1x128x768xbf16>
    %6 = vector.shape_cast %5 : vector<1x128x768xbf16> to vector<128x768xbf16>
    %7 = vector.extract_strided_slice %6 {offsets = [0, 0], sizes = [128, 384], strides = [1, 1]} : vector<128x768xbf16> to vector<128x384xbf16>
    %8 = vector.extract_strided_slice %6 {offsets = [0, 384], sizes = [128, 128], strides = [1, 1]} : vector<128x768xbf16> to vector<128x128xbf16>
    %9 = vector.extract_strided_slice %6 {offsets = [0, 512], sizes = [128, 256], strides = [1, 1]} : vector<128x768xbf16> to vector<128x256xbf16>
    %c0_5 = arith.constant 0 : index
    %c0_6 = arith.constant 0 : index
    %c0_7 = arith.constant 0 : index
    %10 = vector.load %arg7[%c0_5, %c0_6, %c0_7] : memref<1x8x384xf32, #tpu.memory_space<vmem>>, vector<1x8x384xf32>
    %11 = vector.shape_cast %10 : vector<1x8x384xf32> to vector<8x384xf32>
    %12 = vector.extract_strided_slice %11 {offsets = [0, 0], sizes = [1, 384], strides = [1, 1]} : vector<8x384xf32> to vector<1x384xf32>
    %13 = vector.extract_strided_slice %11 {offsets = [1, 0], sizes = [1, 128], strides = [1, 1]} : vector<8x384xf32> to vector<1x128xf32>
    %14 = vector.extract_strided_slice %11 {offsets = [2, 0], sizes = [1, 128], strides = [1, 1]} : vector<8x384xf32> to vector<1x128xf32>
    %15 = vector.extract_strided_slice %11 {offsets = [3, 0], sizes = [1, 128], strides = [1, 1]} : vector<8x384xf32> to vector<1x128xf32>
    %16 = vector.extract_strided_slice %11 {offsets = [4, 0], sizes = [1, 256], strides = [1, 1]} : vector<8x384xf32> to vector<1x256xf32>
    %17 = vector.extract_strided_slice %11 {offsets = [5, 0], sizes = [1, 128], strides = [1, 1]} : vector<8x384xf32> to vector<1x128xf32>
    %18 = vector.extract_strided_slice %11 {offsets = [6, 0], sizes = [1, 128], strides = [1, 1]} : vector<8x384xf32> to vector<1x128xf32>
    %19 = vector.extract_strided_slice %11 {offsets = [7, 0], sizes = [1, 128], strides = [1, 1]} : vector<8x384xf32> to vector<1x128xf32>
    %cst = arith.constant dense<0.000000e+00> : vector<16x384xf32>
    %20 = tpu.matmul %4, %7, %cst {dimension_numbers = #tpu.dot_dimension_numbers<[1], [0], [0], [1], [0, 0, 1, 1], [], []>} : vector<16x128xbf16>, vector<128x384xbf16>, vector<16x384xf32> -> vector<16x384xf32>
    %21 = vector.broadcast %12 : vector<1x384xf32> to vector<16x384xf32>
    %22 = arith.addf %20, %21 : vector<16x384xf32>
    %23 = arith.truncf %22 : vector<16x384xf32> to vector<16x384xbf16>
    %24 = tpu.iota {dimensions = array<i32: 0>} : vector<16x16xi32>
    %25 = tpu.iota {dimensions = array<i32: 1>} : vector<16x16xi32>
    %c1_i32 = arith.constant 1 : i32
    %26 = vector.broadcast %c1_i32 : i32 to vector<16x16xi32>
    %27 = arith.andi %24, %26 : vector<16x16xi32>
    %c1_i32_8 = arith.constant 1 : i32
    %28 = vector.broadcast %c1_i32_8 : i32 to vector<16x16xi32>
    %29 = arith.andi %25, %28 : vector<16x16xi32>
    %30 = arith.cmpi eq, %27, %29 : vector<16x16xi32>
    %c1_i32_9 = arith.constant 1 : i32
    %31 = vector.broadcast %c1_i32_9 : i32 to vector<16x16xi32>
    %32 = arith.shrsi %25, %31 : vector<16x16xi32>
    %c5_i32 = arith.constant 5 : i32
    %33 = vector.broadcast %c5_i32 : i32 to vector<16x16xi32>
    %34 = arith.cmpi slt, %32, %33 : vector<16x16xi32>
    %35 = arith.andi %30, %34 : vector<16x16xi1>
    %cst_10 = arith.constant 0.000000e+00 : f32
    %cst_11 = arith.constant -1.000000e+09 : f32
    %36 = vector.broadcast %cst_10 : f32 to vector<16x16xf32>
    %37 = vector.broadcast %cst_11 : f32 to vector<16x16xf32>
    %38 = arith.select %35, %36, %37 : vector<16x16xi1>, vector<16x16xf32>
    %cst_12 = arith.constant 0.000000e+00 : f32
    %39 = vector.broadcast %cst_12 : f32 to vector<16x128xf32>
    %40 = vector.extract_strided_slice %23 {offsets = [0, 0], sizes = [16, 32], strides = [1, 1]} : vector<16x384xbf16> to vector<16x32xbf16>
    %41 = vector.extract_strided_slice %23 {offsets = [0, 128], sizes = [16, 32], strides = [1, 1]} : vector<16x384xbf16> to vector<16x32xbf16>
    %42 = vector.extract_strided_slice %23 {offsets = [0, 256], sizes = [16, 32], strides = [1, 1]} : vector<16x384xbf16> to vector<16x32xbf16>
    %cst_13 = arith.constant dense<0.000000e+00> : vector<16x16xf32>
    %43 = tpu.matmul %40, %41, %cst_13 {dimension_numbers = #tpu.dot_dimension_numbers<[1], [1], [0], [0], [0, 0, 1, 0], [], []>} : vector<16x32xbf16>, vector<16x32xbf16>, vector<16x16xf32> -> vector<16x16xf32>
    %cst_14 = arith.constant 0.176776692 : f32
    %44 = vector.broadcast %cst_14 : f32 to vector<16x16xf32>
    %45 = arith.mulf %43, %44 : vector<16x16xf32>
    %46 = arith.addf %45, %38 : vector<16x16xf32>
    %cst_15 = arith.constant dense<0xFF800000> : vector<16xf32>
    %47 = vector.multi_reduction <maximumf>, %46, %cst_15 [1] : vector<16x16xf32> to vector<16xf32>
    %48 = vector.shape_cast %47 : vector<16xf32> to vector<16x1xf32>
    %49 = vector.broadcast %48 : vector<16x1xf32> to vector<16x16xf32>
    %50 = arith.subf %46, %49 : vector<16x16xf32>
    %51 = math.exp %50 : vector<16x16xf32>
    %cst_16 = arith.constant dense<0.000000e+00> : vector<16xf32>
    %52 = vector.multi_reduction <add>, %51, %cst_16 [1] : vector<16x16xf32> to vector<16xf32>
    %53 = vector.shape_cast %52 : vector<16xf32> to vector<16x1xf32>
    %54 = tpu.reciprocal %53 {approx = true} : vector<16x1xf32> -> vector<16x1xf32>
    %55 = vector.broadcast %54 : vector<16x1xf32> to vector<16x16xf32>
    %56 = arith.mulf %51, %55 : vector<16x16xf32>
    %57 = arith.truncf %56 : vector<16x16xf32> to vector<16x16xbf16>
    %cst_17 = arith.constant dense<0.000000e+00> : vector<16x32xf32>
    %58 = tpu.matmul %57, %42, %cst_17 {dimension_numbers = #tpu.dot_dimension_numbers<[1], [0], [0], [1], [0, 0, 1, 1], [], []>} : vector<16x16xbf16>, vector<16x32xbf16>, vector<16x32xf32> -> vector<16x32xf32>
    %59 = arith.truncf %58 : vector<16x32xf32> to vector<16x32xbf16>
    %60 = vector.extract_strided_slice %8 {offsets = [0, 0], sizes = [32, 128], strides = [1, 1]} : vector<128x128xbf16> to vector<32x128xbf16>
    %cst_18 = arith.constant dense<0.000000e+00> : vector<16x128xf32>
    %61 = tpu.matmul %59, %60, %cst_18 {dimension_numbers = #tpu.dot_dimension_numbers<[1], [0], [0], [1], [0, 0, 1, 1], [], []>} : vector<16x32xbf16>, vector<32x128xbf16>, vector<16x128xf32> -> vector<16x128xf32>
    %62 = arith.addf %39, %61 : vector<16x128xf32>
    %63 = vector.extract_strided_slice %23 {offsets = [0, 32], sizes = [16, 32], strides = [1, 1]} : vector<16x384xbf16> to vector<16x32xbf16>
    %64 = vector.extract_strided_slice %23 {offsets = [0, 160], sizes = [16, 32], strides = [1, 1]} : vector<16x384xbf16> to vector<16x32xbf16>
    %65 = vector.extract_strided_slice %23 {offsets = [0, 288], sizes = [16, 32], strides = [1, 1]} : vector<16x384xbf16> to vector<16x32xbf16>
    %cst_19 = arith.constant dense<0.000000e+00> : vector<16x16xf32>
    %66 = tpu.matmul %63, %64, %cst_19 {dimension_numbers = #tpu.dot_dimension_numbers<[1], [1], [0], [0], [0, 0, 1, 0], [], []>} : vector<16x32xbf16>, vector<16x32xbf16>, vector<16x16xf32> -> vector<16x16xf32>
    %cst_20 = arith.constant 0.176776692 : f32
    %67 = vector.broadcast %cst_20 : f32 to vector<16x16xf32>
    %68 = arith.mulf %66, %67 : vector<16x16xf32>
    %69 = arith.addf %68, %38 : vector<16x16xf32>
    %cst_21 = arith.constant dense<0xFF800000> : vector<16xf32>
    %70 = vector.multi_reduction <maximumf>, %69, %cst_21 [1] : vector<16x16xf32> to vector<16xf32>
    %71 = vector.shape_cast %70 : vector<16xf32> to vector<16x1xf32>
    %72 = vector.broadcast %71 : vector<16x1xf32> to vector<16x16xf32>
    %73 = arith.subf %69, %72 : vector<16x16xf32>
    %74 = math.exp %73 : vector<16x16xf32>
    %cst_22 = arith.constant dense<0.000000e+00> : vector<16xf32>
    %75 = vector.multi_reduction <add>, %74, %cst_22 [1] : vector<16x16xf32> to vector<16xf32>
    %76 = vector.shape_cast %75 : vector<16xf32> to vector<16x1xf32>
    %77 = tpu.reciprocal %76 {approx = true} : vector<16x1xf32> -> vector<16x1xf32>
    %78 = vector.broadcast %77 : vector<16x1xf32> to vector<16x16xf32>
    %79 = arith.mulf %74, %78 : vector<16x16xf32>
    %80 = arith.truncf %79 : vector<16x16xf32> to vector<16x16xbf16>
    %cst_23 = arith.constant dense<0.000000e+00> : vector<16x32xf32>
    %81 = tpu.matmul %80, %65, %cst_23 {dimension_numbers = #tpu.dot_dimension_numbers<[1], [0], [0], [1], [0, 0, 1, 1], [], []>} : vector<16x16xbf16>, vector<16x32xbf16>, vector<16x32xf32> -> vector<16x32xf32>
    %82 = arith.truncf %81 : vector<16x32xf32> to vector<16x32xbf16>
    %83 = vector.extract_strided_slice %8 {offsets = [32, 0], sizes = [32, 128], strides = [1, 1]} : vector<128x128xbf16> to vector<32x128xbf16>
    %cst_24 = arith.constant dense<0.000000e+00> : vector<16x128xf32>
    %84 = tpu.matmul %82, %83, %cst_24 {dimension_numbers = #tpu.dot_dimension_numbers<[1], [0], [0], [1], [0, 0, 1, 1], [], []>} : vector<16x32xbf16>, vector<32x128xbf16>, vector<16x128xf32> -> vector<16x128xf32>
    %85 = arith.addf %62, %84 : vector<16x128xf32>
    %86 = vector.extract_strided_slice %23 {offsets = [0, 64], sizes = [16, 32], strides = [1, 1]} : vector<16x384xbf16> to vector<16x32xbf16>
    %87 = vector.extract_strided_slice %23 {offsets = [0, 192], sizes = [16, 32], strides = [1, 1]} : vector<16x384xbf16> to vector<16x32xbf16>
    %88 = vector.extract_strided_slice %23 {offsets = [0, 320], sizes = [16, 32], strides = [1, 1]} : vector<16x384xbf16> to vector<16x32xbf16>
    %cst_25 = arith.constant dense<0.000000e+00> : vector<16x16xf32>
    %89 = tpu.matmul %86, %87, %cst_25 {dimension_numbers = #tpu.dot_dimension_numbers<[1], [1], [0], [0], [0, 0, 1, 0], [], []>} : vector<16x32xbf16>, vector<16x32xbf16>, vector<16x16xf32> -> vector<16x16xf32>
    %cst_26 = arith.constant 0.176776692 : f32
    %90 = vector.broadcast %cst_26 : f32 to vector<16x16xf32>
    %91 = arith.mulf %89, %90 : vector<16x16xf32>
    %92 = arith.addf %91, %38 : vector<16x16xf32>
    %cst_27 = arith.constant dense<0xFF800000> : vector<16xf32>
    %93 = vector.multi_reduction <maximumf>, %92, %cst_27 [1] : vector<16x16xf32> to vector<16xf32>
    %94 = vector.shape_cast %93 : vector<16xf32> to vector<16x1xf32>
    %95 = vector.broadcast %94 : vector<16x1xf32> to vector<16x16xf32>
    %96 = arith.subf %92, %95 : vector<16x16xf32>
    %97 = math.exp %96 : vector<16x16xf32>
    %cst_28 = arith.constant dense<0.000000e+00> : vector<16xf32>
    %98 = vector.multi_reduction <add>, %97, %cst_28 [1] : vector<16x16xf32> to vector<16xf32>
    %99 = vector.shape_cast %98 : vector<16xf32> to vector<16x1xf32>
    %100 = tpu.reciprocal %99 {approx = true} : vector<16x1xf32> -> vector<16x1xf32>
    %101 = vector.broadcast %100 : vector<16x1xf32> to vector<16x16xf32>
    %102 = arith.mulf %97, %101 : vector<16x16xf32>
    %103 = arith.truncf %102 : vector<16x16xf32> to vector<16x16xbf16>
    %cst_29 = arith.constant dense<0.000000e+00> : vector<16x32xf32>
    %104 = tpu.matmul %103, %88, %cst_29 {dimension_numbers = #tpu.dot_dimension_numbers<[1], [0], [0], [1], [0, 0, 1, 1], [], []>} : vector<16x16xbf16>, vector<16x32xbf16>, vector<16x32xf32> -> vector<16x32xf32>
    %105 = arith.truncf %104 : vector<16x32xf32> to vector<16x32xbf16>
    %106 = vector.extract_strided_slice %8 {offsets = [64, 0], sizes = [32, 128], strides = [1, 1]} : vector<128x128xbf16> to vector<32x128xbf16>
    %cst_30 = arith.constant dense<0.000000e+00> : vector<16x128xf32>
    %107 = tpu.matmul %105, %106, %cst_30 {dimension_numbers = #tpu.dot_dimension_numbers<[1], [0], [0], [1], [0, 0, 1, 1], [], []>} : vector<16x32xbf16>, vector<32x128xbf16>, vector<16x128xf32> -> vector<16x128xf32>
    %108 = arith.addf %85, %107 : vector<16x128xf32>
    %109 = vector.extract_strided_slice %23 {offsets = [0, 96], sizes = [16, 32], strides = [1, 1]} : vector<16x384xbf16> to vector<16x32xbf16>
    %110 = vector.extract_strided_slice %23 {offsets = [0, 224], sizes = [16, 32], strides = [1, 1]} : vector<16x384xbf16> to vector<16x32xbf16>
    %111 = vector.extract_strided_slice %23 {offsets = [0, 352], sizes = [16, 32], strides = [1, 1]} : vector<16x384xbf16> to vector<16x32xbf16>
    %cst_31 = arith.constant dense<0.000000e+00> : vector<16x16xf32>
    %112 = tpu.matmul %109, %110, %cst_31 {dimension_numbers = #tpu.dot_dimension_numbers<[1], [1], [0], [0], [0, 0, 1, 0], [], []>} : vector<16x32xbf16>, vector<16x32xbf16>, vector<16x16xf32> -> vector<16x16xf32>
    %cst_32 = arith.constant 0.176776692 : f32
    %113 = vector.broadcast %cst_32 : f32 to vector<16x16xf32>
    %114 = arith.mulf %112, %113 : vector<16x16xf32>
    %115 = arith.addf %114, %38 : vector<16x16xf32>
    %cst_33 = arith.constant dense<0xFF800000> : vector<16xf32>
    %116 = vector.multi_reduction <maximumf>, %115, %cst_33 [1] : vector<16x16xf32> to vector<16xf32>
    %117 = vector.shape_cast %116 : vector<16xf32> to vector<16x1xf32>
    %118 = vector.broadcast %117 : vector<16x1xf32> to vector<16x16xf32>
    %119 = arith.subf %115, %118 : vector<16x16xf32>
    %120 = math.exp %119 : vector<16x16xf32>
    %cst_34 = arith.constant dense<0.000000e+00> : vector<16xf32>
    %121 = vector.multi_reduction <add>, %120, %cst_34 [1] : vector<16x16xf32> to vector<16xf32>
    %122 = vector.shape_cast %121 : vector<16xf32> to vector<16x1xf32>
    %123 = tpu.reciprocal %122 {approx = true} : vector<16x1xf32> -> vector<16x1xf32>
    %124 = vector.broadcast %123 : vector<16x1xf32> to vector<16x16xf32>
    %125 = arith.mulf %120, %124 : vector<16x16xf32>
    %126 = arith.truncf %125 : vector<16x16xf32> to vector<16x16xbf16>
    %cst_35 = arith.constant dense<0.000000e+00> : vector<16x32xf32>
    %127 = tpu.matmul %126, %111, %cst_35 {dimension_numbers = #tpu.dot_dimension_numbers<[1], [0], [0], [1], [0, 0, 1, 1], [], []>} : vector<16x16xbf16>, vector<16x32xbf16>, vector<16x32xf32> -> vector<16x32xf32>
    %128 = arith.truncf %127 : vector<16x32xf32> to vector<16x32xbf16>
    %129 = vector.extract_strided_slice %8 {offsets = [96, 0], sizes = [32, 128], strides = [1, 1]} : vector<128x128xbf16> to vector<32x128xbf16>
    %cst_36 = arith.constant dense<0.000000e+00> : vector<16x128xf32>
    %130 = tpu.matmul %128, %129, %cst_36 {dimension_numbers = #tpu.dot_dimension_numbers<[1], [0], [0], [1], [0, 0, 1, 1], [], []>} : vector<16x32xbf16>, vector<32x128xbf16>, vector<16x128xf32> -> vector<16x128xf32>
    %131 = arith.addf %108, %130 : vector<16x128xf32>
    %132 = arith.addf %3, %131 : vector<16x128xf32>
    %133 = vector.broadcast %13 : vector<1x128xf32> to vector<16x128xf32>
    %134 = arith.addf %132, %133 : vector<16x128xf32>
    %cst_37 = arith.constant dense<0.000000e+00> : vector<16xf32>
    %135 = vector.multi_reduction <add>, %134, %cst_37 [1] : vector<16x128xf32> to vector<16xf32>
    %136 = vector.shape_cast %135 : vector<16xf32> to vector<16x1xf32>
    %cst_38 = arith.constant 1.280000e+02 : f32
    %137 = vector.broadcast %cst_38 : f32 to vector<16x1xf32>
    %138 = arith.divf %136, %137 : vector<16x1xf32>
    %139 = arith.mulf %134, %134 : vector<16x128xf32>
    %cst_39 = arith.constant dense<0.000000e+00> : vector<16xf32>
    %140 = vector.multi_reduction <add>, %139, %cst_39 [1] : vector<16x128xf32> to vector<16xf32>
    %141 = vector.shape_cast %140 : vector<16xf32> to vector<16x1xf32>
    %cst_40 = arith.constant 1.280000e+02 : f32
    %142 = vector.broadcast %cst_40 : f32 to vector<16x1xf32>
    %143 = arith.divf %141, %142 : vector<16x1xf32>
    %144 = arith.mulf %138, %138 : vector<16x1xf32>
    %145 = arith.subf %143, %144 : vector<16x1xf32>
    %146 = vector.broadcast %138 : vector<16x1xf32> to vector<16x128xf32>
    %147 = arith.subf %134, %146 : vector<16x128xf32>
    %cst_41 = arith.constant 9.99999974E-6 : f32
    %148 = vector.broadcast %cst_41 : f32 to vector<16x1xf32>
    %149 = arith.addf %145, %148 : vector<16x1xf32>
    %150 = math.rsqrt %149 : vector<16x1xf32>
    %151 = vector.broadcast %150 : vector<16x1xf32> to vector<16x128xf32>
    %152 = arith.mulf %147, %151 : vector<16x128xf32>
    %153 = vector.broadcast %14 : vector<1x128xf32> to vector<16x128xf32>
    %154 = arith.mulf %152, %153 : vector<16x128xf32>
    %155 = vector.broadcast %15 : vector<1x128xf32> to vector<16x128xf32>
    %156 = arith.addf %154, %155 : vector<16x128xf32>
    %157 = arith.truncf %156 : vector<16x128xf32> to vector<16x128xbf16>
    %cst_42 = arith.constant dense<0.000000e+00> : vector<16x256xf32>
    %158 = tpu.matmul %157, %9, %cst_42 {dimension_numbers = #tpu.dot_dimension_numbers<[1], [0], [0], [1], [0, 0, 1, 1], [], []>} : vector<16x128xbf16>, vector<128x256xbf16>, vector<16x256xf32> -> vector<16x256xf32>
    %159 = vector.broadcast %16 : vector<1x256xf32> to vector<16x256xf32>
    %160 = arith.addf %158, %159 : vector<16x256xf32>
    %cst_43 = arith.constant 0.000000e+00 : f32
    %161 = vector.broadcast %cst_43 : f32 to vector<16x256xf32>
    %162 = arith.maximumf %160, %161 : vector<16x256xf32>
    %163 = arith.truncf %162 : vector<16x256xf32> to vector<16x256xbf16>
    %c0_44 = arith.constant 0 : index
    %c0_45 = arith.constant 0 : index
    %c0_46 = arith.constant 0 : index
    %164 = vector.load %arg6[%c0_44, %c0_45, %c0_46] : memref<1x256x128xbf16, #tpu.memory_space<vmem>>, vector<1x256x128xbf16>
    %165 = vector.shape_cast %164 : vector<1x256x128xbf16> to vector<256x128xbf16>
    %cst_47 = arith.constant dense<0.000000e+00> : vector<16x128xf32>
    %166 = tpu.matmul %163, %165, %cst_47 {dimension_numbers = #tpu.dot_dimension_numbers<[1], [0], [0], [1], [0, 0, 1, 1], [], []>} : vector<16x256xbf16>, vector<256x128xbf16>, vector<16x128xf32> -> vector<16x128xf32>
    %167 = vector.broadcast %17 : vector<1x128xf32> to vector<16x128xf32>
    %168 = arith.addf %166, %167 : vector<16x128xf32>
    %169 = arith.addf %156, %168 : vector<16x128xf32>
    %cst_48 = arith.constant dense<0.000000e+00> : vector<16xf32>
    %170 = vector.multi_reduction <add>, %169, %cst_48 [1] : vector<16x128xf32> to vector<16xf32>
    %171 = vector.shape_cast %170 : vector<16xf32> to vector<16x1xf32>
    %cst_49 = arith.constant 1.280000e+02 : f32
    %172 = vector.broadcast %cst_49 : f32 to vector<16x1xf32>
    %173 = arith.divf %171, %172 : vector<16x1xf32>
    %174 = arith.mulf %169, %169 : vector<16x128xf32>
    %cst_50 = arith.constant dense<0.000000e+00> : vector<16xf32>
    %175 = vector.multi_reduction <add>, %174, %cst_50 [1] : vector<16x128xf32> to vector<16xf32>
    %176 = vector.shape_cast %175 : vector<16xf32> to vector<16x1xf32>
    %cst_51 = arith.constant 1.280000e+02 : f32
    %177 = vector.broadcast %cst_51 : f32 to vector<16x1xf32>
    %178 = arith.divf %176, %177 : vector<16x1xf32>
    %179 = arith.mulf %173, %173 : vector<16x1xf32>
    %180 = arith.subf %178, %179 : vector<16x1xf32>
    %181 = vector.broadcast %173 : vector<16x1xf32> to vector<16x128xf32>
    %182 = arith.subf %169, %181 : vector<16x128xf32>
    %cst_52 = arith.constant 9.99999974E-6 : f32
    %183 = vector.broadcast %cst_52 : f32 to vector<16x1xf32>
    %184 = arith.addf %180, %183 : vector<16x1xf32>
    %185 = math.rsqrt %184 : vector<16x1xf32>
    %186 = vector.broadcast %185 : vector<16x1xf32> to vector<16x128xf32>
    %187 = arith.mulf %182, %186 : vector<16x128xf32>
    %188 = vector.broadcast %18 : vector<1x128xf32> to vector<16x128xf32>
    %189 = arith.mulf %187, %188 : vector<16x128xf32>
    %190 = vector.broadcast %19 : vector<1x128xf32> to vector<16x128xf32>
    %191 = arith.addf %189, %190 : vector<16x128xf32>
    %c0_53 = arith.constant 0 : index
    %c0_54 = arith.constant 0 : index
    %192 = vector.load %arg11[%c0_53, %c0_54] : memref<16x128xf32, #tpu.memory_space<vmem>>, vector<16x128xf32>
    tpu.vector_store %arg11[%c0_53, %c0_54], %191 {strides = array<i32>} : memref<16x128xf32, #tpu.memory_space<vmem>>, vector<16x128xf32>,
    %c1_i32_55 = arith.constant 1 : i32
    %193 = arith.cmpi eq, %arg1, %c1_i32_55 : i32
    %194 = arith.extui %193 : i1 to i32
    %c0_i32_56 = arith.constant 0 : i32
    %195 = arith.cmpi ne, %194, %c0_i32_56 : i32
    scf.if %195 {
      %196 = vector.extract_strided_slice %191 {offsets = [0, 0], sizes = [2, 128], strides = [1, 1]} : vector<16x128xf32> to vector<2x128xf32>
      %c0_57 = arith.constant 0 : index
      %c0_58 = arith.constant 0 : index
      %197 = vector.load %arg8[%c0_57, %c0_58] : memref<8x128xf32, #tpu.memory_space<vmem>>, vector<8x128xf32>
      %198 = vector.extract_strided_slice %197 {offsets = [0, 0], sizes = [1, 128], strides = [1, 1]} : vector<8x128xf32> to vector<1x128xf32>
      %199 = vector.extract_strided_slice %197 {offsets = [1, 0], sizes = [1, 128], strides = [1, 1]} : vector<8x128xf32> to vector<1x128xf32>
      %cst_59 = arith.constant dense<0.000000e+00> : vector<2xf32>
      %200 = vector.multi_reduction <add>, %196, %cst_59 [1] : vector<2x128xf32> to vector<2xf32>
      %201 = vector.shape_cast %200 : vector<2xf32> to vector<2x1xf32>
      %cst_60 = arith.constant 1.280000e+02 : f32
      %202 = vector.broadcast %cst_60 : f32 to vector<2x1xf32>
      %203 = arith.divf %201, %202 : vector<2x1xf32>
      %204 = arith.mulf %196, %196 : vector<2x128xf32>
      %cst_61 = arith.constant dense<0.000000e+00> : vector<2xf32>
      %205 = vector.multi_reduction <add>, %204, %cst_61 [1] : vector<2x128xf32> to vector<2xf32>
      %206 = vector.shape_cast %205 : vector<2xf32> to vector<2x1xf32>
      %cst_62 = arith.constant 1.280000e+02 : f32
      %207 = vector.broadcast %cst_62 : f32 to vector<2x1xf32>
      %208 = arith.divf %206, %207 : vector<2x1xf32>
      %209 = arith.mulf %203, %203 : vector<2x1xf32>
      %210 = arith.subf %208, %209 : vector<2x1xf32>
      %211 = vector.broadcast %203 : vector<2x1xf32> to vector<2x128xf32>
      %212 = arith.subf %196, %211 : vector<2x128xf32>
      %cst_63 = arith.constant 9.99999974E-6 : f32
      %213 = vector.broadcast %cst_63 : f32 to vector<2x1xf32>
      %214 = arith.addf %210, %213 : vector<2x1xf32>
      %215 = math.rsqrt %214 : vector<2x1xf32>
      %216 = vector.broadcast %215 : vector<2x1xf32> to vector<2x128xf32>
      %217 = arith.mulf %212, %216 : vector<2x128xf32>
      %218 = vector.broadcast %198 : vector<1x128xf32> to vector<2x128xf32>
      %219 = arith.mulf %217, %218 : vector<2x128xf32>
      %220 = vector.broadcast %199 : vector<1x128xf32> to vector<2x128xf32>
      %221 = arith.addf %219, %220 : vector<2x128xf32>
      %222 = arith.truncf %221 : vector<2x128xf32> to vector<2x128xbf16>
      %c0_64 = arith.constant 0 : index
      %c0_65 = arith.constant 0 : index
      %223 = vector.load %arg9[%c0_64, %c0_65] : memref<128x128xbf16, #tpu.memory_space<vmem>>, vector<128x128xbf16>
      %cst_66 = arith.constant dense<0.000000e+00> : vector<2x128xf32>
      %224 = tpu.matmul %222, %223, %cst_66 {dimension_numbers = #tpu.dot_dimension_numbers<[1], [0], [0], [1], [0, 0, 1, 1], [], []>} : vector<2x128xbf16>, vector<128x128xbf16>, vector<2x128xf32> -> vector<2x128xf32>
      %225 = vector.extract_strided_slice %197 {offsets = [2, 0], sizes = [1, 128], strides = [1, 1]} : vector<8x128xf32> to vector<1x128xf32>
      %226 = vector.broadcast %225 : vector<1x128xf32> to vector<2x128xf32>
      %227 = arith.addf %224, %226 : vector<2x128xf32>
      %c0_67 = arith.constant 0 : index
      %c0_68 = arith.constant 0 : index
      %228 = vector.load %arg10[%c0_67, %c0_68] : memref<2x128xf32, #tpu.memory_space<vmem>>, vector<2x128xf32>
      tpu.vector_store %arg10[%c0_67, %c0_68], %227 {strides = array<i32>} : memref<2x128xf32, #tpu.memory_space<vmem>>, vector<2x128xf32>,
    } else {
    }
    return
  }
  func.func @transform_0(%arg0: i32, %arg1: i32) -> (i32, i32) {
    %c0_i32 = arith.constant 0 : i32
    %c0_i32_0 = arith.constant 0 : i32
    return %arg0, %c0_i32 : i32, i32
  }
  func.func @transform_1(%arg0: i32, %arg1: i32) -> (i32, i32) {
    %c0_i32 = arith.constant 0 : i32
    %c0_i32_0 = arith.constant 0 : i32
    %c0_i32_1 = arith.constant 0 : i32
    return %c0_i32, %c0_i32_0 : i32, i32
  }
  func.func @transform_2(%arg0: i32, %arg1: i32) -> (i32, i32) {
    %c0_i32 = arith.constant 0 : i32
    %c0_i32_0 = arith.constant 0 : i32
    %c0_i32_1 = arith.constant 0 : i32
    return %c0_i32, %c0_i32_0 : i32, i32
  }
  func.func @transform_3(%arg0: i32, %arg1: i32) -> (i32, i32, i32) {
    %c0_i32 = arith.constant 0 : i32
    %c0_i32_0 = arith.constant 0 : i32
    %c0_i32_1 = arith.constant 0 : i32
    return %arg1, %c0_i32, %c0_i32_0 : i32, i32, i32
  }
  func.func @transform_4(%arg0: i32, %arg1: i32) -> (i32, i32, i32) {
    %c0_i32 = arith.constant 0 : i32
    %c0_i32_0 = arith.constant 0 : i32
    %c0_i32_1 = arith.constant 0 : i32
    return %arg1, %c0_i32, %c0_i32_0 : i32, i32, i32
  }
  func.func @transform_5(%arg0: i32, %arg1: i32) -> (i32, i32, i32) {
    %c0_i32 = arith.constant 0 : i32
    %c0_i32_0 = arith.constant 0 : i32
    %c0_i32_1 = arith.constant 0 : i32
    return %arg1, %c0_i32, %c0_i32_0 : i32, i32, i32
  }
  func.func @transform_6(%arg0: i32, %arg1: i32) -> (i32, i32) {
    %c0_i32 = arith.constant 0 : i32
    %c0_i32_0 = arith.constant 0 : i32
    %c0_i32_1 = arith.constant 0 : i32
    return %c0_i32, %c0_i32_0 : i32, i32
  }
  func.func @transform_7(%arg0: i32, %arg1: i32) -> (i32, i32) {
    %c0_i32 = arith.constant 0 : i32
    %c0_i32_0 = arith.constant 0 : i32
    %c0_i32_1 = arith.constant 0 : i32
    return %c0_i32, %c0_i32_0 : i32, i32
  }
  func.func @transform_8(%arg0: i32, %arg1: i32) -> (i32, i32) {
    %c0_i32 = arith.constant 0 : i32
    %c0_i32_0 = arith.constant 0 : i32
    return %arg0, %c0_i32 : i32, i32
  }
}

</mosaic_0001>

<bundles_post_ra>
// kernel: tpu_custom_call.1
= control target key start
LH: loop header
LB: loop body
LE: loop exit
PB: predicated region body
PF: predicated region fallthrough
CT: control target
= control target key end

     0   :  { %s4317_s0 = inlined_call_operand.hbm [shape: bf16[16,768], index: 0, kind: input, shape index: {}]   ;;  %s4318_s1 = inlined_call_operand.hbm [shape: f32[16,128], index: 1, kind: input, shape index: {}]   ;;  %s4319_s2 = inlined_call_operand.hbm [shape: bf16[768,128], index: 2, kind: input, shape index: {}]   ;;  %s4320_s3 = inlined_call_operand.hbm [shape: bf16[2,128,768], index: 3, kind: input, shape index: {}]   ;;  %s4321_s4 = inlined_call_operand.hbm [shape: bf16[2,256,128], index: 4, kind: input, shape index: {}]   ;;  %s4322_s5 = inlined_call_operand.hbm [shape: f32[2,8,384], index: 5, kind: input, shape index: {}]   ;;  %s4323_s6 = inlined_call_operand.vmem [shape: f32[8,128], index: 6, kind: input, shape index: {}]   ;;  %s4324_s7 = inlined_call_operand.hbm [shape: bf16[128,128], index: 7, kind: input, shape index: {}]   ;;  %s4325_s8 = inlined_call_operand.hbm [shape: f32[2,128], index: 8, kind: output, shape index: {}]  }
   0x1   :  { %4338 = sst [smem:[#allocation24_spill]] %s4317_s0 }
   0x2   :  { %4339 = sst [smem:[#allocation25_spill]] %s4318_s1 }
   0x3   :  { %4340 = sst [smem:[#allocation26_spill]] %s4319_s2 }
   0x4   :  { %4341 = sst [smem:[#allocation27_spill]] %s4324_s7 }
   0x5   :  { %13 = vsyncpa [#allocation4], 0 }
   0x6   :  { %14 = vsyncpa [#allocation7], 0 }
   0x7   :  { %15 = vsyncpa [#allocation10], 0 }
   0x8   :  { %17 = vsyncpa [#allocation10 + $0x1], 0 }
   0x9   :  { %18 = vsyncpa [#allocation13], 0 }
   0xa   :  { %20 = vsyncpa [#allocation13 + $0x1], 0 }
   0xb   :  { %21 = vsyncpa [#allocation5], 0  ;;  %s3831_s27 = smov 0   ;;  %s3833_s28 = smov 0  }
   0xc   :  { %s3835_s29 = smov 0   ;;  %s3837_s30 = smov 0  }
   0xd   :  { %s3839_s9 = smov 0   ;;  %s3841_s10 = smov 0  }
   0xe LB: > { %s3860_s11 = sadd.s32 4294967295, %s3761_s10   ;;  %p127_p0 = scmp.ne.s32.totalorder %s3745_s28, %s3741_s27  ;;  %s3761_s10 = sphi %s3841_s10, %s27_s10   ;;  %s3757_s9 = sphi %s3839_s9, %s4372_s9   ;;  %s3753_s30 = sphi %s3837_s30, %s4371_s30   ;;  %s3749_s29 = sphi %s3835_s29, %s4370_s29   ;;  %s3745_s28 = sphi %s3833_s28, %s4369_s28   ;;  %s3741_s27 = sphi %s3831_s27, %s4368_s27  }
   0xf   : > { %p4332_p1 = scmp.eq.s32.totalorder %s3860_s11, 0  ;;  %p2734_p2 = scmp.ge.s32.totalorder %s3761_s10, 1 }
  0x10   : > { %p258_p3 = scmp.lt.s32.totalorder %s3761_s10, 3  ;;  %s3763_s14 = smov [#allocation6]  }
  0x11   : > { %p3868_p4 = por %p4332_p1, %p127_p0  ;;  %s287_s15 = sshll.u32 %s3763_s14, 4  ;;  %s288_s15 = int_to_ptr.vmem [resolvable:$true] %s287_s15 }
  0x12   : > { %p3872_p5 = pnand %p2734_p2, %p258_p3  ;;  %s3764_s17 = smov [#allocation14]  }
  0x13   : > { %s4342_s12 = scalar_select %p3868_p4, 1, 0 }
  0x14   : > { %s4343_s13 = scalar_select %p3872_p5, 1, 0 }
  0x15   : > { %p3182_p6 = pneg %p3872_p5  ;;  %s316_s18 = sshll.u32 %s3764_s17, 4  ;;  %s317_s18 = int_to_ptr.vmem [resolvable:$true] %s316_s18 }
  0x16   : > { %s3490_s19 = scalar_lea.vmem %s288_s15, 256  ;;  %p3498_p12 = scmp.lt.s32.totalorder %s288_s15, %s288_s15 }
  0x17   : > { %p3880_p7 = pnand %p3182_p6, %p4332_p1  ;;  %p3491_p9 = scmp.ne.s32.totalorder %s288_s15, %s3490_s19 }
  0x18   : > { %p3499_p13 = scmp.lt.s32.totalorder %s3490_s19, %s3490_s19 }
  0x19   : > { %p3481_p8 = pneg %p3880_p7 }
  0x1a   : > { %p3500_p0 = por %p3499_p13, %p3498_p12 }
  0x1b   : > { %p3493_p10 = pnand %p3491_p9, %p3481_p8 }
  0x1d   : > { %p3494_p11 = pneg %p3493_p10 }
  0x1f   : > { %p3501_p2 = pnand %p3500_p0, %p3494_p11 }
  0x21   : > { %3504 = shalt.err (!%p3501_p2)
}
  0x22   : > { %s3765_s20 = smov 128   ;;  %s3766_s21 = smov 8  }
  0x23   : > { %s4345_s1 = sld [smem:[#allocation25_spill]]  ;;  %s3516_s24 = scalar_lea.vmem %s317_s18, 1024 }
  0x24   : > { %p3517_p3 = scmp.ne.s32.totalorder %s317_s18, %s3516_s24  ;;  %p3524_p10 = scmp.lt.s32.totalorder %s317_s18, %s317_s18 }
  0x25   : > { %p3525_p12 = scmp.lt.s32.totalorder %s3516_s24, %s3516_s24 }
  0x26   : > { %p3519_p6 = pnand %p3517_p3, %p3481_p8 }
  0x27   : > { %p3526_p11 = por %p3525_p12, %p3524_p10 }
  0x28   : > { %p3520_p9 = pneg %p3519_p6 }
  0x29   : > { %3188 = dma.hbm_to_vmem [thread:$0]  (!%p3880_p7), %s4345_s1, 256, %s288_s15, [#allocation7], %s3765_s20, %s3765_s20, %s3766_s21  }
  0x2a   : > { %p3527_p13 = pnand %p3526_p11, %p3520_p9 }
  0x2c   : > { %3530 = shalt.err (!%p3527_p13)
}
  0x2d   : > { %s4326_s25 = smov 64   ;;  %s4328_s26 = smov 4  }
  0x2e   : > { %s4346_s7 = sld [smem:[#allocation27_spill]]  ;;  %s36_s15 = sadd.s32 1, %s3757_s9 }
  0x2f   : > { %s114_s17 = sadd.s32 1, %s3749_s29  ;;  %p37_p0 = scmp.ge.s32.totalorder %s36_s15, 2 }
  0x30   : > { %p121_p2 = scmp.ne.s32.totalorder %s3749_s29, %s3745_s28  ;;  %p122_p3 = scmp.eq.s32.totalorder %s3761_s10, 0 }
  0x31   : > { %s4374_s15 = smov (%p37_p0, %s36_s15), 0  ;;  %p3209_p9 = scmp.lt.s32.totalorder %s3761_s10, 2 }
  0x32   : > { %4347 = sst [smem:[#allocation22_spill]] %s4374_s15  ;;  %p123_p6 = por %p122_p3, %p121_p2 }
  0x33   : > { %s111_s19 = ssub.s32 %s3757_s9, %s4374_s15  ;;  %s4331_s20 = sand.u32 1, %s3761_s10  }
  0x34   : > { %3194 = dma.hbm_to_vmem [thread:$0]  (!%p3880_p7), %s4346_s7, 1024, %s317_s18, [#allocation13], %s4326_s25, %s4326_s25, %s4328_s26  }
  0x35   : > { %p112_p10 = scmp.eq.s32.totalorder %s111_s19, 0  ;;  %s3917_s21 = sand.u32 1, %s3749_s29  }
  0x36   : > { %s3150_s18 = smul.u32 384, %s3917_s21  ;;  %p3923_p12 = pnand %p3209_p9, %p123_p6 }
  0x37   : > { %s3920_s22 = scalar_select %p112_p10, %s3749_s29, %s114_s17  }
  0x38   : > { %s4349_s23 = scalar_select %p3923_p12, 1, 0 }
  0x39   : > { %4348 = sst [smem:[#allocation23_spill]] %s3920_s22  ;;  %s3151_s24 = smul.u32 6144, %s3757_s9 }
  0x3a   : > { %s334_s26 = scalar_lea.vmem [#allocation9], %s3150_s18  ;;  %s3933_s1 = scalar_lea.sflag [#allocation10], %s4331_s20 }
  0x3b   : > { %s340_s25 = scalar_lea.hbm %s4320_s3, %s3151_s24  ;;  %s341_s19 = sshll.u32 %s334_s26, 4  ;;  %s342_s19 = int_to_ptr.vmem [resolvable:$true] %s341_s19 }
  0x3c   : > { %p4333_p11 = pneg %p3923_p12  ;;  %s3544_s17 = scalar_lea.vmem %s342_s19, 6144 }
  0x3d   : > { %p3545_p13 = scmp.ne.s32.totalorder %s342_s19, %s3544_s17  ;;  %s3769_s7 = smov [#allocation9]  }
  0x3e   : > { %s3549_s15 = sshll.u32 %s3769_s7, 4  ;;  %s3550_s15 = int_to_ptr.vmem [resolvable:$false] %s3549_s15 }
  0x3f   : > { %p3547_p0 = pnand %p3545_p13, %p4333_p11  ;;  %s3551_s22 = scalar_lea.vmem %s3550_s15, 12288 }
  0x40   : > { %p3552_p3 = scmp.lt.s32.totalorder %s342_s19, %s3550_s15  ;;  %p3553_p6 = scmp.lt.s32.totalorder %s3551_s22, %s3544_s17 }
  0x41   : > { %p3548_p2 = pneg %p3547_p0 }
  0x42   : > { %p3554_p9 = por %p3553_p6, %p3552_p3 }
  0x44   : > { %p3555_p10 = pnand %p3554_p9, %p3548_p2 }
  0x46   : > { %3558 = shalt.err (!%p3555_p10)
}
  0x47   : > { %s3770_s26 = smov 384   ;;  %s3771_s18 = smov 24  }
  0x48   : > { %3198 = dma.hbm_to_vmem [thread:$0]  (!%p3923_p12), %s340_s25, 6144, %s342_s19, %s3933_s1, %s3770_s26, %s3770_s26, %s3771_s18  }
  0x49   : > { %s3772_s24 = smov [#allocation3]   ;;  %s3773_s14 = smov [#allocation8]  }
  0x4a   : > { %s274_s27 = sshll.u32 %s3772_s24, 4  ;;  %s300_s20 = sshll.u32 %s3773_s14, 4  ;;  %s275_s27 = int_to_ptr.vmem [resolvable:$true] %s274_s27  ;;  %s301_s20 = int_to_ptr.vmem [resolvable:$true] %s300_s20 }
  0x4b   : > { %s3570_s7 = scalar_lea.vmem %s275_s27, 768  ;;  %p3578_p3 = scmp.lt.s32.totalorder %s275_s27, %s275_s27 }
  0x4c   : > { %p3571_p13 = scmp.ne.s32.totalorder %s275_s27, %s3570_s7  ;;  %p3579_p6 = scmp.lt.s32.totalorder %s3570_s7, %s3570_s7 }
  0x4e   : > { %p3573_p0 = pnand %p3571_p13, %p3481_p8  ;;  %p3580_p9 = por %p3579_p6, %p3578_p3 }
  0x50   : > { %p3574_p2 = pneg %p3573_p0 }
  0x52   : > { %p3581_p10 = pnand %p3580_p9, %p3574_p2 }
  0x54   : > { %3584 = shalt.err (!%p3581_p10)
}
  0x55   : > { %s4350_s0 = sld [smem:[#allocation24_spill]]  ;;  %s3596_s22 = scalar_lea.vmem %s301_s20, 6144 }
  0x56   : > { %p3597_p1 = scmp.ne.s32.totalorder %s301_s20, %s3596_s22  ;;  %p3604_p13 = scmp.lt.s32.totalorder %s301_s20, %s301_s20 }
  0x57   : > { %p3605_p0 = scmp.lt.s32.totalorder %s3596_s22, %s3596_s22 }
  0x58   : > { %p3599_p11 = pnand %p3597_p1, %p3481_p8 }
  0x59   : > { %p3606_p5 = por %p3605_p0, %p3604_p13 }
  0x5a   : > { %p3600_p4 = pneg %p3599_p11 }
  0x5b   : > { %3185 = dma.hbm_to_vmem [thread:$0]  (!%p3880_p7), %s4350_s0, 768, %s275_s27, [#allocation4], %s3770_s26, %s3770_s26, %s3771_s18  }
  0x5c   : > { %p3607_p12 = pnand %p3606_p5, %p3600_p4 }
  0x5e   : > { %3610 = shalt.err (!%p3607_p12)
}
  0x5f   : > { %s4351_s19 = smov 4   ;;  %s4352_s17 = smov 64  }
  0x60   : > { %s4353_s2 = sld [smem:[#allocation26_spill]]  ;;  %s2741_s26 = sshll.u32 %s3917_s21, 7 }
  0x61   : > { %s2895_s18 = sshll.u32 %s3757_s9, 11  ;;  %s355_s15 = scalar_lea.vmem [#allocation11], %s2741_s26 }
  0x62   : > { %s361_s25 = scalar_lea.hbm %s4321_s4, %s2895_s18  ;;  %s362_s22 = sshll.u32 %s355_s15, 4  ;;  %s363_s22 = int_to_ptr.vmem [resolvable:$true] %s362_s22 }
  0x63   : > { %s3152_s16 = smul.u32 24, %s3917_s21  ;;  %s3624_s0 = scalar_lea.vmem %s363_s22, 2048 }
  0x64   : > { %p3625_p1 = scmp.ne.s32.totalorder %s363_s22, %s3624_s0  ;;  %p4354_p4 = scmp.ne.s32.totalorder %s4349_s23, 0 }
  0x65   : > { %s3774_s24 = smov [#allocation11]  }
  0x66   : > { %3191 = dma.hbm_to_vmem [thread:$0]  (!%p3880_p7), %s4353_s2, 6144, %s301_s20, [#allocation7], %s4352_s17, %s4352_s17, %s4351_s19  }
  0x67   : > { %p4355_p5 = pneg %p4354_p4  ;;  %s3629_s14 = sshll.u32 %s3774_s24, 4  ;;  %s3630_s14 = int_to_ptr.vmem [resolvable:$false] %s3629_s14 }
  0x68   : > { %s3631_s20 = scalar_lea.vmem %s3630_s14, 4096  ;;  %p3632_p7 = scmp.lt.s32.totalorder %s363_s22, %s3630_s14 }
  0x69   : > { %p3627_p8 = pnand %p3625_p1, %p4355_p5  ;;  %p3633_p11 = scmp.lt.s32.totalorder %s3631_s20, %s3624_s0 }
  0x6b   : > { %p3628_p12 = pneg %p3627_p8  ;;  %p3634_p2 = por %p3633_p11, %p3632_p7 }
  0x6d   : > { %p3635_p3 = pnand %p3634_p2, %p3628_p12 }
  0x6f   : > { %3638 = shalt.err (!%p3635_p3)
}
  0x70   : > { %3201 = dma.hbm_to_vmem [thread:$0]  (!%p4354_p4), %s361_s25, 2048, %s363_s22, %s3933_s1, %s4352_s17, %s4352_s17, %s4351_s19  }
  0x71   : > { %s3153_s21 = smul.u32 384, %s3757_s9  ;;  %s376_s26 = scalar_lea.vmem [#allocation12], %s3152_s16 }
  0x72   : > { %s384_s18 = sshll.u32 %s376_s26, 4  ;;  %s4356_s15 = sand.u32 1, %s3761_s10   ;;  %s385_s18 = int_to_ptr.vmem [resolvable:$true] %s384_s18 }
  0x73   : > { %s382_s0 = scalar_lea.hbm %s4322_s5, %s3153_s21  ;;  %s373_s24 = scalar_lea.sflag [#allocation13], %s4356_s15 }
  0x74   : > { %s3652_s14 = scalar_lea.vmem %s385_s18, 384  ;;  %p4357_p9 = pmov %p4355_p5 }
  0x75   : > { %p3653_p6 = scmp.ne.s32.totalorder %s385_s18, %s3652_s14  ;;  %s3775_s20 = smov [#allocation12]  }
  0x76   : > { %s3657_s2 = sshll.u32 %s3775_s20, 4  ;;  %s3658_s2 = int_to_ptr.vmem [resolvable:$false] %s3657_s2 }
  0x77   : > { %p3655_p10 = pnand %p3653_p6, %p4357_p9  ;;  %s3659_s1 = scalar_lea.vmem %s3658_s2, 768 }
  0x78   : > { %p3660_p0 = scmp.lt.s32.totalorder %s385_s18, %s3658_s2  ;;  %p3661_p1 = scmp.lt.s32.totalorder %s3659_s1, %s3652_s14 }
  0x79   : > { %p3656_p13 = pneg %p3655_p10 }
  0x7a   : > { %p3662_p5 = por %p3661_p1, %p3660_p0 }
  0x7c   : > { %p3663_p8 = pnand %p3662_p5, %p3656_p13 }
  0x7e   : > { %3666 = shalt.err (!%p3663_p8)
}
  0x7f   : > { %3204 = dma.hbm_to_vmem [thread:$0]  (!%p4354_p4), %s382_s0, 384, %s385_s18, %s373_s24  }
  0x80   : > { %p4358_p12 = scmp.ne.s32.totalorder %s4343_s13, 0 }
  0x81   : > { %p4359_p7 = scmp.eq.s32.totalorder (!%p4358_p12), %s3860_s11, 0 }
  0x82   : > { %393 = sbr.rel (%p4358_p12) target bundleno = 4093 (0xffd), region = 52 }
  0x87   : > { %3716 = dma.done.wait (%p4359_p7), [#allocation4], 768   ;;  %p4360_p11 = pmov %p4359_p7 }
  0x88   : > { %p4361_p2 = pmov %p4359_p7 }
  0x89   : > { %3718 = vsyncadd (%p4360_p11), [#allocation4], 4294966528 }
  0x8a   : > { %3720 = dma.done.wait (%p4361_p2), [#allocation7], 6400   ;;  %p4362_p3 = pmov %p4361_p2 }
  0x8b   : > { %s407_s2 = sand.u32 1, %s3860_s11   ;;  %s409_s23 = sand.u32 1, %s3745_s28  }
  0x8c   : > { %3722 = vsyncadd (%p4362_p3), [#allocation7], 4294960896  ;;  %s3154_s19 = smul.u32 384, %s409_s23  ;;  %s408_s13 = scalar_lea.sflag [#allocation10], %s407_s2 }
  0x8d   : > { %p4363_p4 = scmp.ne.s32.totalorder %s4342_s12, 0 }
  0x8e   : > { %s4000_s17 = scalar_lea.vmem [#allocation9], %s3154_s19 }
  0x8f   : > { %3724 = dma.done.wait (%p4363_p4), %s408_s13, 8192  }
  0x90   : > { %3726 = vsyncadd (%p4363_p4), %s408_s13, 4294959104  ;;  %s2749_s25 = sshll.u32 %s409_s23, 7  ;;  %s3155_s22 = smul.u32 24, %s409_s23 }
  0x91   : > { %s4006_s16 = scalar_lea.vmem [#allocation11], %s2749_s25  ;;  %s426_s21 = scalar_lea.sflag [#allocation13], %s407_s2 }
  0x92   : > { %s4008_s26 = scalar_lea.vmem [#allocation12], %s3155_s22 }
  0x93   : > { %3728 = dma.done.wait (%p4363_p4), %s426_s21, 384  }
  0x94   : > { %3730 = vsyncadd (%p4363_p4), %s426_s21, 4294966912  ;;  %p4364_p6 = pmov %p4361_p2 }
  0x95   : > { %p4365_p9 = pmov %p4361_p2 }
  0x96   : > { %3732 = dma.done.wait (%p4364_p6), [#allocation13], 1024  }
  0x97   : > { %3734 = vsyncadd (%p4365_p9), [#allocation13], 4294966272  ;;  %p2751_p10 = scmp.ne.s32.totalorder %s3753_s30, 0 }
  0x99   : > { %476 = sbr.rel (%p2751_p10) target bundleno = 430 (0x1ae), region = 84 }
  0x9e   : > { %v3284_v0 = vld [vmem:[#allocation8 + $0x78] sm:$0xff]   ;;  %v3288_v4 = vld [vmem:[#allocation8 + $0x70] sm:$0xff]   ;;  %v3292_v8 = vld [vmem:[#allocation8 + $0x68] sm:$0xff]  }
  0x9f   : > { %v3285_v1 = vld [vmem:[#allocation8 + $0xf8] sm:$0xff]   ;;  %2896 = vmatprep.subr.bf16.mxu0 %v3284_v0  ;;  %v3289_v5 = vld [vmem:[#allocation8 + $0xf0] sm:$0xff]   ;;  %v3293_v9 = vld [vmem:[#allocation8 + $0xe8] sm:$0xff]  }
  0xa0   : > { %v3286_v2 = vld [vmem:[#allocation8 + $0x38] sm:$0xff]   ;;  %2918 = vmatprep.subr.bf16.mxu1 %v3285_v1  ;;  %v3290_v6 = vld [vmem:[#allocation8 + $0x30] sm:$0xff]   ;;  %v3294_v10 = vld [vmem:[#allocation8 + $0x28] sm:$0xff]  }
  0xa1   : > { %v3287_v3 = vld [vmem:[#allocation8 + $0xb8] sm:$0xff]   ;;  %2897 = vmatpush3.bf16.msra.mxu0 %v3286_v2  ;;  %v3291_v7 = vld [vmem:[#allocation8 + $0xb0] sm:$0xff]   ;;  %v3295_v11 = vld [vmem:[#allocation8 + $0xa8] sm:$0xff]  }
  0xa2   : > { %2919 = vmatpush3.bf16.msra.mxu1 %v3287_v3  ;;  %2898 = vmatprep.subr.bf16.mxu0 %v3288_v4  ;;  %v3296_v12 = vld [vmem:[#allocation8 + $0x60] sm:$0xff]   ;;  %v3300_v16 = vld [vmem:[#allocation8 + $0x58] sm:$0xff]   ;;  %v3304_v20 = vld [vmem:[#allocation8 + $0x50] sm:$0xff]  }
  0xa3   : > { %2920 = vmatprep.subr.bf16.mxu1 %v3289_v5  ;;  %v3297_v13 = vld [vmem:[#allocation8 + $0xe0] sm:$0xff]   ;;  %v3301_v17 = vld [vmem:[#allocation8 + $0xd8] sm:$0xff]   ;;  %v3305_v21 = vld [vmem:[#allocation8 + $0xd0] sm:$0xff]  }
  0xa4   : > { %v3298_v14 = vld [vmem:[#allocation8 + $0x20] sm:$0xff]   ;;  %v3302_v18 = vld [vmem:[#allocation8 + $0x18] sm:$0xff]   ;;  %v3306_v22 = vld [vmem:[#allocation8 + $0x10] sm:$0xff]  }
  0xa5   : > { %2899 = vmatpush3.bf16.msra.mxu0 %v3290_v6  ;;  %v3299_v15 = vld [vmem:[#allocation8 + $0xa0] sm:$0xff]   ;;  %v3303_v19 = vld [vmem:[#allocation8 + $0x98] sm:$0xff]   ;;  %v3307_v23 = vld [vmem:[#allocation8 + $0x90] sm:$0xff]  }
  0xa6   : > { %2921 = vmatpush3.bf16.msra.mxu1 %v3291_v7  ;;  %2900 = vmatprep.subr.bf16.mxu0 %v3292_v8  ;;  %v3308_v24 = vld [vmem:[#allocation8 + $0x48] sm:$0xff]   ;;  %v3312_v28 = vld [vmem:[#allocation8 + $0x40] sm:$0xff]   ;;  %v3322_v36 = vld [vmem:[#allocation8 + $0x178] sm:$0xff]  }
  0xa7   : > { %2922 = vmatprep.subr.bf16.mxu1 %v3293_v9  ;;  %v3309_v25 = vld [vmem:[#allocation8 + $0xc8] sm:$0xff]   ;;  %v3313_v29 = vld [vmem:[#allocation8 + $0xc0] sm:$0xff]   ;;  %v3323_v37 = vld [vmem:[#allocation8 + $0x138] sm:$0xff]  }
  0xa8   : > { %v3310_v26 = vld [vmem:[#allocation8 + $0x8] sm:$0xff]   ;;  %v3314_v30 = vld [vmem:[#allocation8] sm:$0xff]   ;;  %v3324_v38 = vld [vmem:[#allocation8 + $0x170] sm:$0xff]  }
  0xa9   : > { %2901 = vmatpush3.bf16.msra.mxu0 %v3294_v10  ;;  %v3311_v27 = vld [vmem:[#allocation8 + $0x88] sm:$0xff]   ;;  %v3315_v31 = vld [vmem:[#allocation8 + $0x80] sm:$0xff]   ;;  %v3325_v39 = vld [vmem:[#allocation8 + $0x130] sm:$0xff]  }
  0xaa   : > { %2923 = vmatpush3.bf16.msra.mxu1 %v3295_v11  ;;  %2902 = vmatprep.subr.bf16.mxu0 %v3296_v12  ;;  %v3316_v32 = vld [vmem:[#allocation3] ss:$24 sps:$4 sm:$0xff]   ;;  %v3318_v33 = vld [vmem:[#allocation3 + $0x4] ss:$24 sps:$4 sm:$0xff]   ;;  %v3326_v40 = vld [vmem:[#allocation8 + $0x168] sm:$0xff]  }
  0xab   : > { %2924 = vmatprep.subr.bf16.mxu1 %v3297_v13  ;;  %v3319_v34 = vld [vmem:[#allocation3 + $0x8] ss:$24 sps:$4 sm:$0xff]   ;;  %v3321_v35 = vld [vmem:[#allocation3 + $0xc] ss:$24 sps:$4 sm:$0xff]   ;;  %929 = vmatprep.mubr.bf16.mxu0 %v3318_v33  ;;  %v3330_v44 = vld [vmem:[#allocation8 + $0x158] sm:$0xff]  }
  0xac   : > { %970 = vmatprep.mubr.bf16.mxu1 %v3321_v35  ;;  %v3327_v41 = vld [vmem:[#allocation8 + $0x128] sm:$0xff]   ;;  %v3328_v42 = vld [vmem:[#allocation8 + $0x160] sm:$0xff]   ;;  %v3331_v45 = vld [vmem:[#allocation8 + $0x118] sm:$0xff]  }
  0xad   : > { %2903 = vmatpush3.bf16.msra.mxu0 %v3298_v14  ;;  %v3329_v43 = vld [vmem:[#allocation8 + $0x120] sm:$0xff]   ;;  %v3332_v46 = vld [vmem:[#allocation8 + $0x150] sm:$0xff]   ;;  %v3334_v49 = vld [vmem:[#allocation8 + $0x148] sm:$0xff]  }
  0xae   : > { %2925 = vmatpush3.bf16.msra.mxu1 %v3299_v15  ;;  %2904 = vmatprep.subr.bf16.mxu0 %v3300_v16  ;;  %v3340_v47 = vld [vmem:[#allocation3 + $0x14] ss:$24 sps:$4 sm:$0xff]   ;;  %v3336_v51 = vld [vmem:[#allocation8 + $0x140] sm:$0xff]   ;;  %v3338_v53 = vld [vmem:[#allocation3 + $0x10] ss:$24 sps:$4 sm:$0xff]  }
  0xaf   : > { %2926 = vmatprep.subr.bf16.mxu1 %v3301_v17  ;;  %v3333_v48 = vld [vmem:[#allocation8 + $0x110] sm:$0xff]   ;;  %v3335_v50 = vld [vmem:[#allocation8 + $0x108] sm:$0xff]   ;;  %v3337_v52 = vld [vmem:[#allocation8 + $0x100] sm:$0xff]  }
  0xb0   : > { %v1020_v6 = vld [vmem:[#allocation6] sm:$0xff]  ;;  %v1021_v13 = vld [vmem:[#allocation6 + $0x8] sm:$0xff] }
  0xb1   : > { %2905 = vmatpush3.bf16.msra.mxu0 %v3302_v18 }
  0xb2   : > { %2927 = vmatpush3.bf16.msra.mxu1 %v3303_v19  ;;  %2906 = vmatprep.subr.bf16.mxu0 %v3304_v20 }
  0xb3   : > { %2928 = vmatprep.subr.bf16.mxu1 %v3305_v21 }
  0xb5   : > { %2907 = vmatpush3.bf16.msra.mxu0 %v3306_v22 }
  0xb6   : > { %2929 = vmatpush3.bf16.msra.mxu1 %v3307_v23  ;;  %2908 = vmatprep.subr.bf16.mxu0 %v3308_v24 }
  0xb7   : > { %2930 = vmatprep.subr.bf16.mxu1 %v3309_v25 }
  0xb9   : > { %2909 = vmatpush3.bf16.msra.mxu0 %v3310_v26 }
  0xba   : > { %2931 = vmatpush3.bf16.msra.mxu1 %v3311_v27  ;;  %2910 = vmatprep.subr.bf16.mxu0 %v3312_v28 }
  0xbb   : > { %2932 = vmatprep.subr.bf16.mxu1 %v3313_v29 }
  0xbd   : > { %2911 = vmatpush3.bf16.msra.mxu0 %v3314_v30 }
  0xbe   : > { %2933 = vmatpush3.bf16.msra.mxu1 %v3315_v31  ;;  %2940 = vmatprep.subr.bf16.mxu0 %v3322_v36 }
  0xc0   : > { %930 = vmatmul.mubr.bf16.vlgmr.msra.gmra.mxu0 %v3316_v32 }
  0xc1   : > { %971 = vmatmul.mubr.bf16.vlgmr.msra.gmra.mxu1 %v3319_v34  ;;  %2941 = vmatpush3.bf16.msra.mxu0 %v3323_v37 }
  0xc2   : > { %2942 = vmatprep.subr.bf16.mxu0 %v3324_v38  ;;  %1011 = vmatprep.mubr.bf16.mxu0 %v3340_v47 }
  0xc5   : > { %2943 = vmatpush3.bf16.msra.mxu0 %v3325_v39 }
  0xc6   : > { %2944 = vmatprep.subr.bf16.mxu0 %v3326_v40 }
  0xc9   : > { %2945 = vmatpush3.bf16.msra.mxu0 %v3327_v41 }
  0xca   : > { %2946 = vmatprep.subr.bf16.mxu0 %v3328_v42 }
  0xcd   : > { %2947 = vmatpush3.bf16.msra.mxu0 %v3329_v43 }
  0xce   : > { %2948 = vmatprep.subr.bf16.mxu0 %v3330_v44 }
  0xd1   : > { %2949 = vmatpush3.bf16.msra.mxu0 %v3331_v45 }
  0xd2   : > { %2950 = vmatprep.subr.bf16.mxu0 %v3332_v46 }
  0xd5   : > { %2951 = vmatpush3.bf16.msra.mxu0 %v3333_v48 }
  0xd6   : > { %2952 = vmatprep.subr.bf16.mxu0 %v3334_v49 }
  0xd9   : > { %2953 = vmatpush3.bf16.msra.mxu0 %v3335_v50 }
  0xda   : > { %2954 = vmatprep.subr.bf16.mxu0 %v3336_v51 }
  0xdd   : > { %2955 = vmatpush3.bf16.msra.mxu0 %v3337_v52 }
  0xe0   : > { %1012 = vmatmul.mubr.bf16.vlgmr.msra.gmra.mxu0 %v3338_v53 }
 0x180   : > { %v2912_v54 = vpop.f32.mrf.mxu0 }
 0x181   : > { %v2934_v55 = vpop.f32.mrf.mxu1 }
 0x182   : > { %v2913_v56 = vpop.f32.mrf.mxu0 }
 0x183   : > { %v2935_v57 = vpop.f32.mrf.mxu1  ;;  %v2914_v61 = vadd.f32 %v2913_v56, %v2912_v54 }
 0x184   : > { %v2915_v58 = vpop.f32.mrf.mxu0  ;;  %v2936_v62 = vadd.f32 %v2935_v57, %v2934_v55 }
 0x185   : > { %v2937_v59 = vpop.f32.mrf.mxu1 }
 0x186   : > { %v2916_v60 = vpop.f32.mrf.mxu0  ;;  %v973_v2 = vadd.f32 %v2936_v62, %v2914_v61 }
 0x187   : > { %v2938_v63 = vpop.f32.mrf.mxu1  ;;  %v2917_v3 = vadd.f32 %v2916_v60, %v2915_v58 }
 0x188   : > { %v2939_v4 = vadd.f32 %v2938_v63, %v2937_v59 }
 0x18a   : > { %v976_v10 = vadd.f32 %v2939_v4, %v2917_v3 }
 0x1a0   : > { %v2956_v0 = vpop.f32.mrf.mxu0 }
 0x1a2   : > { %v2957_v1 = vpop.f32.mrf.mxu0 }
 0x1a3   : > { %v2958_v5 = vadd.f32 %v2957_v1, %v2956_v0 }
 0x1a4   : > { %v2959_v7 = vpop.f32.mrf.mxu0 }
 0x1a5   : > { %v1014_v8 = vadd.f32 %v2958_v5, %v973_v2 }
 0x1a6   : > { %v2960_v9 = vpop.f32.mrf.mxu0 }
 0x1a7   : > { %v1022_v11 = vadd.f32 %v1020_v6, %v1014_v8  ;;  %v2961_v12 = vadd.f32 %v2960_v9, %v2959_v7 }
 0x1a9   : > { %1024 = vst [vmem:[#allocation2] sm:$0xff] %v1022_v11  ;;  %v1017_v14 = vadd.f32 %v2961_v12, %v976_v10 }
 0x1ab   : > { %v1023_v15 = vadd.f32 %v1021_v13, %v1017_v14 }
 0x1ad   : > { %1025 = vst [vmem:[#allocation2 + $0x8] sm:$0xff] %v1023_v15 }
 0x1ae PF: > { %v3341_v16 = vld [vmem:[%s4000_s17 + $0x154] ss:$24 sps:$4 sm:$0xff]   ;;  %v3343_v17 = vld [vmem:[%s4000_s17 + $0x150] ss:$24 sps:$4 sm:$0xff]   ;;  %v3776_v18 = vmov 0   ;;  %v3777_v36 = vmov 0.0   ;;  %v1080_v37 = vlaneseq }
 0x1af   : > { %1252 = vmatprep.mubr.bf16.mxu0 %v3776_v18  ;;  %1220 = vmatprep.subr.bf16.mxu0 %v3341_v16  ;;  %v3344_v19 = vld [vmem:[%s4000_s17 + $0x124] ss:$24 sps:$4 sm:$0xff]   ;;  %v3346_v20 = vld [vmem:[%s4000_s17 + $0x120] ss:$24 sps:$4 sm:$0xff]   ;;  %v3347_v21 = vld [vmem:[%s4000_s17 + $0xf4] ss:$24 sps:$4 sm:$0xff]  }
 0x1b0   : > { %1221 = vmatpush1.bf16.msra.mxu0 %v3343_v17  ;;  %v3349_v22 = vld [vmem:[%s4000_s17 + $0xf0] ss:$24 sps:$4 sm:$0xff]   ;;  %v3350_v23 = vld [vmem:[%s4000_s17 + $0xc4] ss:$24 sps:$4 sm:$0xff]   ;;  %v3352_v24 = vld [vmem:[%s4000_s17 + $0xc0] ss:$24 sps:$4 sm:$0xff]   ;;  %3030 = vmatprep.subr.bf16.mxu1 %v3777_v36 }
 0x1b1   : > { %1222 = vmatprep.subr.bf16.mxu0 %v3344_v19  ;;  %v3353_v25 = vld [vmem:[%s4000_s17 + $0x94] ss:$24 sps:$4 sm:$0xff]   ;;  %v3355_v26 = vld [vmem:[%s4000_s17 + $0x90] ss:$24 sps:$4 sm:$0xff]   ;;  %v3356_v27 = vld [vmem:[%s4000_s17 + $0x64] ss:$24 sps:$4 sm:$0xff]  }
 0x1b2   : > { %v3358_v28 = vld [vmem:[%s4000_s17 + $0x60] ss:$24 sps:$4 sm:$0xff]   ;;  %v3359_v29 = vld [vmem:[%s4000_s17 + $0x34] ss:$24 sps:$4 sm:$0xff]   ;;  %v3361_v30 = vld [vmem:[%s4000_s17 + $0x30] ss:$24 sps:$4 sm:$0xff]  }
 0x1b3   : > { %v3362_v31 = vld [vmem:[%s4000_s17 + $0x4] ss:$24 sps:$4 sm:$0xff]   ;;  %v3364_v32 = vld [vmem:[%s4000_s17] ss:$24 sps:$4 sm:$0xff]   ;;  %v4036_v33 = vld [vmem:[#allocation2] sm:$0xff]  ;;  %vm3778_vm0 = vmmov 0  }
 0x1b4   : > { %1223 = vmatpush1.bf16.msra.mxu0 %v3346_v20  ;;  %v4038_v34 = vld [vmem:[#allocation2 + $0x8] sm:$0xff]  ;;  %3046 = vmatprep.mubr.msk.bf16.mxu1 %vm3778_vm0, %v3777_v36  ;;  %v4049_v38 = vshrl.u32 %v1080_v37, 7  ;;  %v4052_v40 = vld [vmem:[%s4008_s26 + $0x8] sm:$0xff]  ;;  %vm1323_vm1 = vcmask 261120   ;;  %s3779_s12 = smov 96   ;;  %v1311_v4 = vand.u32 127, %v1080_v37 }
 0x1b5   : > { %1224 = vmatprep.subr.bf16.mxu0 %v3347_v21  ;;  %v1028_v35 = vpack.c.bf16 %v4038_v34, %v4036_v33  ;;  %v4060_v44 = vld [vmem:[%s4008_s26] sm:$0xff]  ;;  %v3780_v11 = vmov -1e+09   ;;  %vm1375_vm7 = vcmask 130048   ;;  %s3781_s18 = smov 64   ;;  %s3782_s27 = smov 32  }
 0x1b6   : > { %v4055_v41 = vsub.s32 0, %v4049_v38  ;;  %v3365_v55 = vld [vmem:[%s4000_s17 + $0x158] ss:$24 sps:$4 sm:$0xff]   ;;  %v3368_v56 = vld [vmem:[%s4000_s17 + $0x128] ss:$24 sps:$4 sm:$0xff]   ;;  %v1312_v5 = vand.u32 1, %v4049_v38 }
 0x1b7   : > { %3031 = vmatpush3.bf16.msra.mxu1 %v3365_v55  ;;  %v3371_v57 = vld [vmem:[%s4000_s17 + $0xf8] ss:$24 sps:$4 sm:$0xff]   ;;  %v3374_v58 = vld [vmem:[%s4000_s17 + $0xc8] ss:$24 sps:$4 sm:$0xff]   ;;  %v3379_v1 = vld [vmem:[%s4000_s17 + $0x9c] ss:$24 sps:$4 sm:$0xff]  }
 0x1b8   : > { %1225 = vmatpush1.bf16.msra.mxu0 %v3349_v22  ;;  %v1087_v43 = vrot.slane %v4052_v40, %v4055_v41  ;;  %v1083_v47 = vrot.slane %v4060_v44, %v4055_v41  ;;  %3032 = vmatprep.subr.bf16.mxu1 %v3777_v36  ;;  %v3377_v59 = vld [vmem:[%s4000_s17 + $0x98] ss:$24 sps:$4 sm:$0xff]   ;;  %v3380_v60 = vld [vmem:[%s4000_s17 + $0x68] ss:$24 sps:$4 sm:$0xff]   ;;  %v3382_v3 = vld [vmem:[%s4000_s17 + $0x6c] ss:$24 sps:$4 sm:$0xff]  }
 0x1b9   : > { %1226 = vmatprep.subr.bf16.mxu0 %v3350_v23  ;;  %v3383_v61 = vld [vmem:[%s4000_s17 + $0x38] ss:$24 sps:$4 sm:$0xff]   ;;  %v3386_v62 = vld [vmem:[%s4000_s17 + $0x8] ss:$24 sps:$4 sm:$0xff]   ;;  %v1314_v6 = vand.u32 1, %v1311_v4  ;;  %v1317_v7 = vshra.s32 %v1311_v4, 1 }
 0x1ba   : > { %v1309_v8 = vadd.s32 8, %v4049_v38  ;;  %p2882_p13 = scmp.ne.s32.totalorder %s3753_s30, 1 }
 0x1bb   : > { %3033 = vmatpush3.bf16.msra.mxu1 %v3368_v56  ;;  %vm1315_vm2 = vcmp.eq.s32.totalorder %v1312_v5, %v1314_v6  ;;  %vm1318_vm3 = vcmp.lt.s32.totalorder %v1317_v7, 5 }
 0x1bc   : > { %1227 = vmatpush1.bf16.msra.mxu0 %v3352_v24  ;;  %3034 = vmatprep.subr.bf16.mxu1 %v3777_v36  ;;  %v1313_v9 = vand.u32 1, %v1309_v8  ;;  %vm1319_vm4 = vmand %vm1315_vm2, %vm1318_vm3 }
 0x1bd   : > { %1228 = vmatprep.subr.bf16.mxu0 %v3353_v25  ;;  %v4109_v12 = vsel %vm1319_vm4, 0.0, %v3780_v11 }
 0x1be   : > { %vm1316_vm5 = vcmp.eq.s32.totalorder %v1313_v9, %v1314_v6 }
 0x1bf   : > { %3035 = vmatpush3.bf16.msra.mxu1 %v3371_v57  ;;  %vm1320_vm6 = vmand %vm1316_vm5, %vm1318_vm3 }
 0x1c0   : > { %1229 = vmatpush1.bf16.msra.mxu0 %v3355_v26  ;;  %3036 = vmatprep.subr.bf16.mxu1 %v3777_v36  ;;  %v4112_v17 = vsel %vm1320_vm6, 0.0, %v3780_v11 }
 0x1c1   : > { %1230 = vmatprep.subr.bf16.mxu0 %v3356_v27 }
 0x1c3   : > { %3037 = vmatpush3.bf16.msra.mxu1 %v3374_v58 }
 0x1c4   : > { %1231 = vmatpush1.bf16.msra.mxu0 %v3358_v28  ;;  %3038 = vmatprep.subr.bf16.mxu1 %v3777_v36 }
 0x1c5   : > { %1232 = vmatprep.subr.bf16.mxu0 %v3359_v29 }
 0x1c7   : > { %3039 = vmatpush3.bf16.msra.mxu1 %v3377_v59 }
 0x1c8   : > { %1233 = vmatpush1.bf16.msra.mxu0 %v3361_v30  ;;  %3040 = vmatprep.subr.bf16.mxu1 %v3777_v36 }
 0x1c9   : > { %1234 = vmatprep.subr.bf16.mxu0 %v3362_v31 }
 0x1cb   : > { %3041 = vmatpush3.bf16.msra.mxu1 %v3380_v60 }
 0x1cc   : > { %1235 = vmatpush1.bf16.msra.mxu0 %v3364_v32  ;;  %3042 = vmatprep.subr.bf16.mxu1 %v3777_v36 }
 0x1cd   : > { %3050 = vmatprep.subr.bf16.mxu0 %v3777_v36 }
 0x1cf   : > { %1253 = vmatmul.mubr.bf16.vlgmr.msra.gmra.mxu0 %v1028_v35  ;;  %3043 = vmatpush3.bf16.msra.mxu1 %v3383_v61 }
 0x1d0   : > { %3052 = vmatprep.mubr.msk.bf16.mxu0 %vm3778_vm0, %v3777_v36  ;;  %3044 = vmatprep.subr.bf16.mxu1 %v3777_v36 }
 0x1d3   : > { %3045 = vmatpush3.bf16.msra.mxu1 %v3386_v62 }
 0x1d4   : > { %3056 = vmatprep.subr.bf16.mxu1 %v3777_v36 }
 0x1d6   : > { %3047 = vmatmul.mubr.bf16.vlgmr.msra.gmra.mxu1 %v1028_v35 }
 0x1d7   : > { %3058 = vmatprep.mubr.msk.bf16.mxu1 %vm3778_vm0, %v3777_v36 }
 0x28f   : > { %v1254_v39 = vpop.f32.mrf.mxu0 }
 0x290   : > { %v1255_v52 = vadd.f32 %v1254_v39, %v1083_v47 }
 0x291   : > { %v1256_v42 = vpop.f32.mrf.mxu0 }
 0x292   : > { %v1257_v48 = vadd.f32 %v1256_v42, %v1087_v43 }
 0x293   : > { %v1258_v45 = vpop.f32.mrf.mxu0 }
 0x294   : > { %v1259_v50 = vadd.f32 %v1258_v45, %v1083_v47  ;;  %v1079_v47 = vld [vmem:[%s4008_s26 + $0x10] sm:$0xff] }
 0x295   : > { %v1260_v46 = vpop.f32.mrf.mxu0 }
 0x296   : > { %v1261_v49 = vadd.f32 %v1260_v46, %v1087_v43  ;;  %v4070_v54 = vpack.c.bf16 %v1259_v50, %v1255_v52 }
 0x298   : > { %v4064_v51 = vpack.c.bf16 %v1261_v49, %v1257_v48  ;;  %v1297_v48 = vpop.f32.mrf.mxu1  ;;  %v1091_v49 = vrot.slane %v1079_v47, %v4055_v41  ;;  %v3373_v47 = vld [vmem:[%s4000_s17 + $0xfc] ss:$24 sps:$4 sm:$0xff]  }
 0x29a   : > { %1448 = vrot.lane.b32.xlu0 %v4064_v51, %s3779_s12  ;;  %v1328_v53 = vsel %vm1323_vm1, %v4064_v51, 0  ;;  %v3048_v50 = vpop.f32.mrf.mxu1  ;;  %v1298_v52 = vadd.f32 %v1297_v48, %v1091_v49 }
 0x29b   : > { %3051 = vmatpush3.bf16.xpose.msra.mxu0 %v1328_v53 }
 0x29c   : > { %3062 = vmatprep.subr.bf16.mxu0 %v3777_v36  ;;  %v1300_v53 = vpop.f32.mrf.mxu1 }
 0x29d   : > { %v1301_v55 = vadd.f32 %v1300_v53, %v1091_v49  ;;  %v3376_v49 = vld [vmem:[%s4000_s17 + $0xcc] ss:$24 sps:$4 sm:$0xff]  }
 0x29e   : > { %1445 = vrot.lane.b32.xlu0 %v4070_v54, %s3779_s12  ;;  %v3049_v56 = vpop.f32.mrf.mxu1 }
 0x29f   : > { %v4125_v58 = vpack.c.bf16 %v1301_v55, %v1298_v52 }
 0x2a1   : > { %3057 = vmatpush3.bf16.msra.mxu1 %v4125_v58 }
 0x2a2   : > { %3053 = vmatmul.mubr.msk.bf16.vlgmr.msra.gmra.mxu0 %vm1323_vm1, %v4070_v54  ;;  %3068 = vmatprep.subr.bf16.mxu1 %v3777_v36 }
 0x2a3   : > { %3064 = vmatprep.mubr.msk.bf16.mxu0 %vm3778_vm0, %v3777_v36 }
 0x30c   : > { %v1449_v63 = vpop.permute.xlu0 %1448 }
 0x30d   : > { %v1454_v0 = vsel %vm1323_vm1, %v1449_v63, 0 }
 0x30e   : > { %3063 = vmatpush3.bf16.xpose.msra.mxu0 %v1454_v0 }
 0x30f   : > { %3074 = vmatprep.subr.bf16.mxu0 %v3777_v36 }
 0x310   : > { %v1446_v2 = vpop.permute.xlu0 %1445 }
 0x315   : > { %3065 = vmatmul.mubr.msk.bf16.vlgmr.msra.gmra.mxu0 %vm1323_vm1, %v1446_v2 }
 0x316   : > { %3075 = vmatpush3.bf16.msra.mxu0 %v3379_v1  ;;  %3078 = vmatprep.mubr.msk.bf16.mxu0 %vm3778_vm0, %v3777_v36 }
 0x317   : > { %3076 = vmatprep.subr.bf16.mxu0 %v3777_v36 }
 0x31a   : > { %3077 = vmatpush3.bf16.msra.mxu0 %v3382_v3 }
 0x31b   : > { %3090 = vmatprep.subr.bf16.mxu0 %v3777_v36 }
 0x362   : > { %v1364_v10 = vpop.f32.mrf.mxu0 }
 0x363   : > { %v1371_v13 = vmul.f32 0.17677669, %v1364_v10 }
 0x364   : > { %v3054_v14 = vpop.f32.mrf.mxu0 }
 0x365   : > { %v1373_v15 = vadd.f32 %v1371_v13, %v4109_v12 }
 0x366   : > { %v1367_v16 = vpop.f32.mrf.mxu0 }
 0x367   : > { %v1372_v19 = vmul.f32 0.17677669, %v1367_v16  ;;  %v1376_v20 = vsel %vm1375_vm7, %v1373_v15, -inf }
 0x368   : > { %1377 = vmax.xlane.f32.xlu1 %v1376_v20  ;;  %v3055_v21 = vpop.f32.mrf.mxu0 }
 0x369   : > { %v1374_v22 = vadd.f32 %v1372_v19, %v4112_v17 }
 0x36b   : > { %v1379_v23 = vsel %vm1375_vm7, %v1374_v22, -inf }
 0x36c   : > { %1380 = vmax.xlane.f32.xlu1 %v1379_v23 }
 0x3d5   : > { %v1490_v24 = vpop.f32.mrf.mxu0 }
 0x3d6   : > { %v1497_v25 = vmul.f32 0.17677669, %v1490_v24 }
 0x3d7   : > { %v3066_v26 = vpop.f32.mrf.mxu0 }
 0x3d8   : > { %v1499_v27 = vadd.f32 %v1497_v25, %v4109_v12  ;;  %v3385_v25 = vld [vmem:[%s4000_s17 + $0x3c] ss:$24 sps:$4 sm:$0xff]  }
 0x3d9   : > { %v1493_v28 = vpop.f32.mrf.mxu0 }
 0x3da   : > { %v1498_v29 = vmul.f32 0.17677669, %v1493_v28  ;;  %v1501_v30 = vsel %vm1375_vm7, %v1499_v27, -inf }
 0x3db   : > { %1502 = vmax.xlane.f32.xlu0 %v1501_v30  ;;  %v3067_v31 = vpop.f32.mrf.mxu0 }
 0x3dc   : > { %v1500_v32 = vadd.f32 %v1498_v29, %v4112_v17 }
 0x3de   : > { %v1504_v35 = vsel %vm1375_vm7, %v1500_v32, -inf }
 0x3df   : > { %1505 = vmax.xlane.f32.xlu1 %v1504_v35 }
 0x3f1   : > { %v1378_v37 = vpop.xlane.xlu1 %1377  ;;  %1679 = vrot.lane.b32.xlu0 %v4064_v51, %s3781_s18 }
 0x3f2   : > { %v1382_v39 = vsub.f32 %v1373_v15, %v1378_v37 }
 0x3f4   : > { %v1384_v42 = vmul.f32 1.442695, %v1382_v39 }
 0x3f5   : > { %v1381_v43 = vpop.xlane.xlu1 %1380 }
 0x3f6   : > { %3429 = vpow2.f32 %v1384_v42  ;;  %v1383_v45 = vsub.f32 %v1374_v22, %v1381_v43 }
 0x3f8   : > { %v1386_v46 = vmul.f32 1.442695, %v1383_v45 }
 0x3fa   : > { %3431 = vpow2.f32 %v1386_v46 }
 0x403   : > { %v3430_v57 = vpop.eup %3429 }
 0x404   : > { %v1388_v59 = vsel %vm1375_vm7, %v3430_v57, 0.0 }
 0x405   : > { %1389 = vadd.xlane.f32.xlu1 %v1388_v59 }
 0x407   : > { %v3432_v60 = vpop.eup %3431 }
 0x408   : > { %v1391_v61 = vsel %vm1375_vm7, %v3432_v60, 0.0 }
 0x409   : > { %1392 = vadd.xlane.f32.xlu1 %v1391_v61 }
 0x464   : > { %v1503_v62 = vpop.xlane.xlu0 %1502 }
 0x465   : > { %v1507_v63 = vsub.f32 %v1499_v27, %v1503_v62  ;;  %v3388_v27 = vld [vmem:[%s4000_s17 + $0xc] ss:$24 sps:$4 sm:$0xff]  }
 0x467   : > { %v1509_v0 = vmul.f32 1.442695, %v1507_v63 }
 0x468   : > { %v1506_v1 = vpop.xlane.xlu1 %1505  ;;  %v1680_v39 = vpop.permute.xlu0 %1679 }
 0x469   : > { %3433 = vpow2.f32 %v1509_v0  ;;  %v1508_v2 = vsub.f32 %v1500_v32, %v1506_v1  ;;  %v1685_v46 = vsel %vm1323_vm1, %v1680_v39, 0 }
 0x46b   : > { %v1511_v3 = vmul.f32 1.442695, %v1508_v2 }
 0x46d   : > { %3435 = vpow2.f32 %v1511_v3 }
 0x476   : > { %v3434_v4 = vpop.eup %3433 }
 0x477   : > { %v1513_v5 = vsel %vm1375_vm7, %v3434_v4, 0.0 }
 0x478   : > { %1514 = vadd.xlane.f32.xlu1 %v1513_v5 }
 0x47a   : > { %v3436_v6 = vpop.eup %3435 }
 0x47b   : > { %v1516_v7 = vsel %vm1375_vm7, %v3436_v6, 0.0 }
 0x47c   : > { %1517 = vadd.xlane.f32.xlu1 %v1516_v7 }
 0x48d   : > { %1525 = vrot.lane.b32.xlu1 %v4125_v58, %s3779_s12 }
 0x48e   : > { %v1390_v8 = vpop.xlane.xlu1 %1389 }
 0x48f   : > { %3437 = vrcp.f32 %v1390_v8 }
 0x491   : > { %1677 = vrot.lane.b32.xlu1 %v4070_v54, %s3781_s18 }
 0x492   : > { %v1393_v9 = vpop.xlane.xlu1 %1392 }
 0x493   : > { %3439 = vrcp.f32 %v1393_v9 }
 0x49c   : > { %v3438_v10 = vpop.eup %3437 }
 0x49d   : > { %v1396_v13 = vmul.f32 %v3438_v10, %v3430_v57 }
 0x4a0   : > { %v3440_v11 = vpop.eup %3439 }
 0x4a1   : > { %v1397_v14 = vmul.f32 %v3440_v11, %v3432_v60 }
 0x4a3   : > { %v1398_v15 = vpack.c.bf16 %v1397_v14, %v1396_v13 }
 0x4a5   : > { %3059 = vmatmul.mubr.msk.bf16.vlgmr.msra.gmra.mxu1 %vm1375_vm7, %v1398_v15 }
 0x4a6   : > { %3070 = vmatprep.mubr.msk.bf16.mxu1 %vm3778_vm0, %v3777_v36 }
 0x501   : > { %v1515_v16 = vpop.xlane.xlu1 %1514 }
 0x502   : > { %3441 = vrcp.f32 %v1515_v16 }
 0x505   : > { %v1518_v19 = vpop.xlane.xlu1 %1517 }
 0x506   : > { %3443 = vrcp.f32 %v1518_v19 }
 0x509   : > { %v1526_v20 = vpop.permute.xlu1 %1525 }
 0x50a   : > { %3069 = vmatpush3.bf16.msra.mxu1 %v1526_v20 }
 0x50b   : > { %3082 = vmatprep.subr.bf16.mxu1 %v3777_v36 }
 0x50d   : > { %v1678_v48 = vpop.permute.xlu1 %1677 }
 0x50f   : > { %v3442_v21 = vpop.eup %3441 }
 0x510   : > { %v1521_v23 = vmul.f32 %v3442_v21, %v3434_v4 }
 0x513   : > { %v3444_v22 = vpop.eup %3443 }
 0x514   : > { %v1522_v24 = vmul.f32 %v3444_v22, %v3436_v6 }
 0x516   : > { %v1523_v26 = vpack.c.bf16 %v1522_v24, %v1521_v23 }
 0x518   : > { %3071 = vmatmul.mubr.msk.bf16.vlgmr.msra.gmra.mxu1 %vm1375_vm7, %v1523_v26 }
 0x519   : > { %3083 = vmatpush3.bf16.msra.mxu1 %v3385_v25  ;;  %3086 = vmatprep.mubr.msk.bf16.mxu1 %vm3778_vm0, %v3777_v36 }
 0x51a   : > { %3084 = vmatprep.subr.bf16.mxu1 %v3777_v36 }
 0x51d   : > { %3085 = vmatpush3.bf16.msra.mxu1 %v3388_v27 }
 0x51e   : > { %3096 = vmatprep.subr.bf16.mxu1 %v3777_v36 }
 0x565   : > { %v1436_v28 = vpop.f32.mrf.mxu1 }
 0x567   : > { %v3060_v29 = vpop.f32.mrf.mxu1 }
 0x569   : > { %v1439_v30 = vpop.f32.mrf.mxu1 }
 0x56a   : > { %v1443_v31 = vpack.c.bf16 %v1439_v30, %v1436_v28  ;;  %v3370_v30 = vld [vmem:[%s4000_s17 + $0x12c] ss:$24 sps:$4 sm:$0xff]  }
 0x56b   : > { %v3061_v32 = vpop.f32.mrf.mxu1 }
 0x56c   : > { %3087 = vmatmul.mubr.msk.bf16.vlgmr.msra.gmra.mxu1 %vm1323_vm1, %v1443_v31 }
 0x56d   : > { %3098 = vmatprep.mubr.msk.bf16.mxu1 %vm3778_vm0, %v3777_v36 }
 0x5d8   : > { %v1565_v35 = vpop.f32.mrf.mxu1 }
 0x5da   : > { %v3072_v37 = vpop.f32.mrf.mxu1 }
 0x5dc   : > { %v1568_v42 = vpop.f32.mrf.mxu1 }
 0x5dd   : > { %v1572_v43 = vpack.c.bf16 %v1568_v42, %v1565_v35 }
 0x5de   : > { %v3073_v45 = vpop.f32.mrf.mxu1 }
 0x5df   : > { %3079 = vmatmul.mubr.msk.bf16.vlgmr.msra.gmra.mxu0 %vm1323_vm1, %v1572_v43 }
 0x5e0   : > { %3091 = vmatpush3.bf16.xpose.msra.mxu0 %v1685_v46  ;;  %3092 = vmatprep.mubr.msk.bf16.mxu0 %vm3778_vm0, %v3777_v36 }
 0x5e1   : > { %3102 = vmatprep.subr.bf16.mxu0 %v3777_v36 }
 0x5e7   : > { %3093 = vmatmul.mubr.msk.bf16.vlgmr.msra.gmra.mxu0 %vm1323_vm1, %v1678_v48 }
 0x5e8   : > { %3103 = vmatpush3.bf16.msra.mxu0 %v3373_v47  ;;  %3106 = vmatprep.mubr.msk.bf16.mxu0 %vm3778_vm0, %v3777_v36 }
 0x5e9   : > { %3104 = vmatprep.subr.bf16.mxu0 %v3777_v36 }
 0x5ec   : > { %3105 = vmatpush3.bf16.msra.mxu0 %v3376_v49 }
 0x5ed   : > { %3116 = vmatprep.subr.bf16.mxu0 %v3777_v36 }
 0x62c   : > { %v4163_v50 = vpop.f32.mrf.mxu1 }
 0x62e   : > { %v3088_v52 = vpop.f32.mrf.mxu1 }
 0x630   : > { %v4165_v53 = vpop.f32.mrf.mxu1 }
 0x632   : > { %v3089_v55 = vpop.f32.mrf.mxu1 }
 0x69f   : > { %v4167_v56 = vpop.f32.mrf.mxu0 }
 0x6a1   : > { %v3080_v57 = vpop.f32.mrf.mxu0 }
 0x6a3   : > { %v4169_v59 = vpop.f32.mrf.mxu0 }
 0x6a5   : > { %v3081_v60 = vpop.f32.mrf.mxu0 }
 0x6a7   : > { %v1721_v61 = vpop.f32.mrf.mxu0 }
 0x6a8   : > { %v1728_v62 = vmul.f32 0.17677669, %v1721_v61 }
 0x6a9   : > { %v3094_v63 = vpop.f32.mrf.mxu0 }
 0x6aa   : > { %v1730_v0 = vadd.f32 %v1728_v62, %v4109_v12 }
 0x6ab   : > { %v1724_v1 = vpop.f32.mrf.mxu0 }
 0x6ac   : > { %v1729_v2 = vmul.f32 0.17677669, %v1724_v1  ;;  %v1732_v3 = vsel %vm1375_vm7, %v1730_v0, -inf }
 0x6ad   : > { %1733 = vmax.xlane.f32.xlu1 %v1732_v3  ;;  %v3095_v4 = vpop.f32.mrf.mxu0 }
 0x6ae   : > { %v1731_v5 = vadd.f32 %v1729_v2, %v4112_v17 }
 0x6b0   : > { %v1735_v6 = vsel %vm1375_vm7, %v1731_v5, -inf }
 0x6b1   : > { %1736 = vmax.xlane.f32.xlu0 %v1735_v6 }
 0x6c7   : > { %1755 = vrot.lane.b32.xlu0 %v4125_v58, %s3781_s18 }
 0x736   : > { %v1734_v7 = vpop.xlane.xlu1 %1733 }
 0x737   : > { %v1738_v8 = vsub.f32 %v1730_v0, %v1734_v7  ;;  %v1674_v7 = vadd.f32 %v4165_v53, %v4169_v59 }
 0x739   : > { %v1740_v9 = vmul.f32 1.442695, %v1738_v8 }
 0x73a   : > { %v1737_v10 = vpop.xlane.xlu0 %1736 }
 0x73b   : > { %3445 = vpow2.f32 %v1740_v9  ;;  %v1739_v11 = vsub.f32 %v1731_v5, %v1737_v10 }
 0x73d   : > { %v1742_v13 = vmul.f32 1.442695, %v1739_v11 }
 0x73e   : > { %v1756_v14 = vpop.permute.xlu0 %1755 }
 0x73f   : > { %3447 = vpow2.f32 %v1742_v13  ;;  %3097 = vmatpush3.bf16.msra.mxu1 %v1756_v14 }
 0x740   : > { %3110 = vmatprep.subr.bf16.mxu1 %v3777_v36 }
 0x748   : > { %v3446_v15 = vpop.eup %3445 }
 0x749   : > { %v1744_v16 = vsel %vm1375_vm7, %v3446_v15, 0.0 }
 0x74a   : > { %1745 = vadd.xlane.f32.xlu1 %v1744_v16 }
 0x74c   : > { %v3448_v19 = vpop.eup %3447 }
 0x74d   : > { %v1747_v20 = vsel %vm1375_vm7, %v3448_v19, 0.0 }
 0x74e   : > { %1748 = vadd.xlane.f32.xlu1 %v1747_v20 }
 0x75f   : > { %1859 = vrot.lane.b32.xlu1 %v4064_v51, %s3782_s27  ;;  %v3367_v51 = vld [vmem:[%s4000_s17 + $0x15c] ss:$24 sps:$4 sm:$0xff]  }
 0x763   : > { %1857 = vrot.lane.b32.xlu1 %v4070_v54, %s3782_s27 }
 0x7d3   : > { %v1746_v21 = vpop.xlane.xlu1 %1745 }
 0x7d4   : > { %3449 = vrcp.f32 %v1746_v21 }
 0x7d7   : > { %v1749_v22 = vpop.xlane.xlu1 %1748 }
 0x7d8   : > { %3451 = vrcp.f32 %v1749_v22  ;;  %v2041_v22 = vsub.s32 1, %v4049_v38 }
 0x7db   : > { %v1860_v27 = vpop.permute.xlu1 %1859 }
 0x7dc   : > { %v1865_v29 = vsel %vm1323_vm1, %v1860_v27, 0 }
 0x7df   : > { %v1858_v54 = vpop.permute.xlu1 %1857 }
 0x7e1   : > { %v3450_v23 = vpop.eup %3449 }
 0x7e2   : > { %v1752_v25 = vmul.f32 %v3450_v23, %v3446_v15 }
 0x7e5   : > { %v3452_v24 = vpop.eup %3451 }
 0x7e6   : > { %v1753_v26 = vmul.f32 %v3452_v24, %v3448_v19 }
 0x7e8   : > { %v1754_v28 = vpack.c.bf16 %v1753_v26, %v1752_v25  ;;  %v2042_v25 = vrot.slane %v4060_v44, %v2041_v22 }
 0x7ea   : > { %3099 = vmatmul.mubr.msk.bf16.vlgmr.msra.gmra.mxu1 %vm1375_vm7, %v1754_v28 }
 0x7eb   : > { %3111 = vmatpush3.bf16.xpose.msra.mxu1 %v1865_v29  ;;  %3112 = vmatprep.mubr.msk.bf16.mxu1 %vm3778_vm0, %v3777_v36 }
 0x7ec   : > { %3122 = vmatprep.subr.bf16.mxu1 %v3777_v36 }
 0x7f2   : > { %3113 = vmatmul.mubr.msk.bf16.vlgmr.msra.gmra.mxu1 %vm1323_vm1, %v1858_v54 }
 0x7f3   : > { %3123 = vmatpush3.bf16.msra.mxu1 %v3367_v51  ;;  %3126 = vmatprep.mubr.msk.bf16.mxu1 %vm3778_vm0, %v3777_v36 }
 0x7f4   : > { %3124 = vmatprep.subr.bf16.mxu1 %v3777_v36 }
 0x7f7   : > { %3125 = vmatpush3.bf16.msra.mxu1 %v3370_v30 }
 0x8aa   : > { %v1795_v31 = vpop.f32.mrf.mxu1 }
 0x8ac   : > { %v3100_v32 = vpop.f32.mrf.mxu1 }
 0x8ad   : > { %v3391_v32 = vld [vmem:[%s4000_s17 + $0x164] ss:$24 sps:$4 sm:$0xff]  }
 0x8ae   : > { %v1798_v35 = vpop.f32.mrf.mxu1 }
 0x8af   : > { %v1802_v37 = vpack.c.bf16 %v1798_v35, %v1795_v31  ;;  %v3389_v35 = vld [vmem:[%s4000_s17 + $0x160] ss:$24 sps:$4 sm:$0xff]  }
 0x8b0   : > { %v3101_v39 = vpop.f32.mrf.mxu1 }
 0x8b1   : > { %3107 = vmatmul.mubr.msk.bf16.vlgmr.msra.gmra.mxu0 %vm1323_vm1, %v1802_v37  ;;  %v3392_v37 = vld [vmem:[%s4000_s17 + $0x130] ss:$24 sps:$4 sm:$0xff]   ;;  %v3397_v39 = vld [vmem:[%s4000_s17 + $0x104] ss:$24 sps:$4 sm:$0xff]  }
 0x8b2   : > { %v1901_v42 = vpop.f32.mrf.mxu1  ;;  %3118 = vmatprep.mubr.msk.bf16.mxu0 %vm3778_vm0, %v3777_v36 }
 0x8b3   : > { %v1908_v43 = vmul.f32 0.17677669, %v1901_v42  ;;  %v3395_v42 = vld [vmem:[%s4000_s17 + $0x100] ss:$24 sps:$4 sm:$0xff]  }
 0x8b4   : > { %v3114_v45 = vpop.f32.mrf.mxu1 }
 0x8b5   : > { %v1910_v46 = vadd.f32 %v1908_v43, %v4109_v12  ;;  %v3398_v43 = vld [vmem:[%s4000_s17 + $0xd0] ss:$24 sps:$4 sm:$0xff]   ;;  %v3400_v45 = vld [vmem:[%s4000_s17 + $0xd4] ss:$24 sps:$4 sm:$0xff]  }
 0x8b6   : > { %v1904_v47 = vpop.f32.mrf.mxu1 }
 0x8b7   : > { %v1909_v48 = vmul.f32 0.17677669, %v1904_v47  ;;  %v1912_v49 = vsel %vm1375_vm7, %v1910_v46, -inf  ;;  %v3401_v47 = vld [vmem:[%s4000_s17 + $0xa0] ss:$24 sps:$4 sm:$0xff]  }
 0x8b8   : > { %1913 = vmax.xlane.f32.xlu0 %v1912_v49  ;;  %v3115_v52 = vpop.f32.mrf.mxu1  ;;  %v3404_v49 = vld [vmem:[%s4000_s17 + $0x70] ss:$24 sps:$4 sm:$0xff]  }
 0x8b9   : > { %v1911_v55 = vadd.f32 %v1909_v48, %v4112_v17  ;;  %v3406_v48 = vld [vmem:[%s4000_s17 + $0x74] ss:$24 sps:$4 sm:$0xff]   ;;  %v3409_v52 = vld [vmem:[%s4000_s17 + $0x44] ss:$24 sps:$4 sm:$0xff]  }
 0x8bb   : > { %v1915_v57 = vsel %vm1375_vm7, %v1911_v55, -inf }
 0x8bc   : > { %1916 = vmax.xlane.f32.xlu1 %v1915_v57  ;;  %v3412_v57 = vld [vmem:[%s4000_s17 + $0x14] ss:$24 sps:$4 sm:$0xff]  }
 0x8cd   : > { %1935 = vrot.lane.b32.xlu1 %v4125_v58, %s3782_s27  ;;  %v1671_v58 = vadd.f32 %v4163_v50, %v4167_v56 }
 0x941   : > { %v1914_v60 = vpop.xlane.xlu0 %1913 }
 0x942   : > { %v1918_v36 = vsub.f32 %v1910_v46, %v1914_v60  ;;  %v3403_v46 = vld [vmem:[%s4000_s17 + $0xa4] ss:$24 sps:$4 sm:$0xff]   ;;  %v3410_v60 = vld [vmem:[%s4000_s17 + $0x10] ss:$24 sps:$4 sm:$0xff]  }
 0x944   : > { %v1920_v61 = vmul.f32 1.442695, %v1918_v36  ;;  %v3413_v36 = vld [vmem:[%s4006_s16 + $0x78] sm:$0xff]  }
 0x945   : > { %v1917_v62 = vpop.xlane.xlu1 %1916  ;;  %2999 = vmatprep.subr.bf16.mxu1 %v3413_v36 }
 0x946   : > { %3453 = vpow2.f32 %v1920_v61  ;;  %v1919_v12 = vsub.f32 %v1911_v55, %v1917_v62  ;;  %v3407_v55 = vld [vmem:[%s4000_s17 + $0x40] ss:$24 sps:$4 sm:$0xff]   ;;  %v3415_v62 = vld [vmem:[%s4006_s16 + $0x70] sm:$0xff]  }
 0x947   : > { %v3414_v61 = vld [vmem:[%s4006_s16 + $0x38] sm:$0xff]  }
 0x948   : > { %v1922_v63 = vmul.f32 1.442695, %v1919_v12  ;;  %v3416_v12 = vld [vmem:[%s4006_s16 + $0x30] sm:$0xff]  }
 0x949   : > { %v1936_v0 = vpop.permute.xlu1 %1935 }
 0x94a   : > { %3455 = vpow2.f32 %v1922_v63  ;;  %3117 = vmatpush3.bf16.msra.mxu0 %v1936_v0  ;;  %v3417_v63 = vld [vmem:[%s4006_s16 + $0x68] sm:$0xff]  }
 0x94b   : > { %2173 = vmatprep.subr.bf16.mxu0 %v3391_v32  ;;  %v3418_v0 = vld [vmem:[%s4006_s16 + $0x28] sm:$0xff]  }
 0x94c   : > { %v3426_v32 = vld [vmem:[%s4006_s16 + $0x8] sm:$0xff]  }
 0x953   : > { %v3454_v1 = vpop.eup %3453 }
 0x954   : > { %v1924_v2 = vsel %vm1375_vm7, %v3454_v1, 0.0 }
 0x955   : > { %1925 = vadd.xlane.f32.xlu0 %v1924_v2  ;;  %v3420_v2 = vld [vmem:[%s4006_s16 + $0x20] sm:$0xff]  }
 0x957   : > { %v3456_v17 = vpop.eup %3455 }
 0x958   : > { %v1927_v3 = vsel %vm1375_vm7, %v3456_v17, 0.0 }
 0x959   : > { %1928 = vadd.xlane.f32.xlu0 %v1927_v3  ;;  %v3422_v3 = vld [vmem:[%s4006_s16 + $0x18] sm:$0xff]  }
 0x971   : > { %v1848_v4 = vpop.f32.mrf.mxu0 }
 0x972   : > { %v1855_v5 = vadd.f32 %v1848_v4, %v1671_v58 }
 0x973   : > { %v3108_v6 = vpop.f32.mrf.mxu0 }
 0x975   : > { %v1851_v8 = vpop.f32.mrf.mxu0 }
 0x976   : > { %v1856_v9 = vadd.f32 %v1851_v8, %v1674_v7 }
 0x977   : > { %v3109_v10 = vpop.f32.mrf.mxu0 }
 0x9de   : > { %v1926_v11 = vpop.xlane.xlu0 %1925 }
 0x9df   : > { %3457 = vrcp.f32 %v1926_v11 }
 0x9e2   : > { %v1929_v13 = vpop.xlane.xlu0 %1928 }
 0x9e3   : > { %3459 = vrcp.f32 %v1929_v13 }
 0x9ec   : > { %v3458_v14 = vpop.eup %3457 }
 0x9ed   : > { %v1932_v16 = vmul.f32 %v3458_v14, %v3454_v1  ;;  %v3419_v1 = vld [vmem:[%s4006_s16 + $0x60] sm:$0xff]  }
 0x9f0   : > { %v3460_v15 = vpop.eup %3459 }
 0x9f1   : > { %v1933_v19 = vmul.f32 %v3460_v15, %v3456_v17  ;;  %v3421_v17 = vld [vmem:[%s4006_s16 + $0x58] sm:$0xff]  }
 0x9f3   : > { %v1934_v20 = vpack.c.bf16 %v1933_v19, %v1932_v16 }
 0x9f5   : > { %3119 = vmatmul.mubr.msk.bf16.vlgmr.msra.gmra.mxu0 %vm1375_vm7, %v1934_v20  ;;  %v2074_v20 = vsub.s32 2, %v4049_v38 }
 0x9f6   : > { %2205 = vmatprep.mubr.bf16.mxu0 %v3776_v18  ;;  %2174 = vmatpush1.bf16.msra.mxu0 %v3389_v35  ;;  %v3428_v35 = vld [vmem:[%s4006_s16] sm:$0xff]  }
 0xab5   : > { %v1975_v50 = vpop.f32.mrf.mxu0 }
 0xab7   : > { %v3120_v56 = vpop.f32.mrf.mxu0 }
 0xab9   : > { %v1978_v21 = vpop.f32.mrf.mxu0 }
 0xaba   : > { %v1982_v53 = vpack.c.bf16 %v1978_v21, %v1975_v50 }
 0xabb   : > { %v3121_v59 = vpop.f32.mrf.mxu0 }
 0xabc   : > { %3127 = vmatmul.mubr.msk.bf16.vlgmr.msra.gmra.mxu1 %vm1323_vm1, %v1982_v53  ;;  %v2075_v53 = vrot.slane %v4060_v44, %v2074_v20  ;;  %v2080_v59 = vsub.s32 3, %v4049_v38 }
 0xabd   : > { %3000 = vmatpush3.bf16.msra.mxu1 %v3414_v61 }
 0xabe   : > { %3001 = vmatprep.subr.bf16.mxu1 %v3415_v62 }
 0xac1   : > { %3002 = vmatpush3.bf16.msra.mxu1 %v3416_v12  ;;  %v2256_v12 = vsub.s32 5, %v4049_v38 }
 0xac2   : > { %3003 = vmatprep.subr.bf16.mxu1 %v3417_v63 }
 0xac3   : > { %v2257_v63 = vrot.slane %v4060_v44, %v2256_v12 }
 0xac5   : > { %3004 = vmatpush3.bf16.msra.mxu1 %v3418_v0 }
 0xac6   : > { %3005 = vmatprep.subr.bf16.mxu1 %v3419_v1 }
 0xac9   : > { %3006 = vmatpush3.bf16.msra.mxu1 %v3420_v2 }
 0xaca   : > { %3007 = vmatprep.subr.bf16.mxu1 %v3421_v17 }
 0xacd   : > { %3008 = vmatpush3.bf16.msra.mxu1 %v3422_v3 }
 0xb7c   : > { %v2028_v23 = vpop.f32.mrf.mxu1 }
 0xb7d   : > { %v2035_v24 = vadd.f32 %v2028_v23, %v1855_v5 }
 0xb7e   : > { %v3128_v26 = vpop.f32.mrf.mxu1 }
 0xb7f   : > { %v2037_v18 = vadd.f32 %v2035_v24, %v4036_v33 }
 0xb80   : > { %v2031_v27 = vpop.f32.mrf.mxu1 }
 0xb81   : > { %v2036_v28 = vadd.f32 %v2031_v27, %v1856_v9  ;;  %v4218_v29 = vadd.f32 %v2042_v25, %v2037_v18  ;;  %v2081_v18 = vrot.slane %v4060_v44, %v2080_v59 }
 0xb82   : > { %v3129_v51 = vpop.f32.mrf.mxu1 }
 0xb83   : > { %2045 = vadd.xlane.f32.xlu0 %v4218_v29  ;;  %v2038_v54 = vadd.f32 %v2036_v28, %v4038_v34  ;;  %v2052_v30 = vmul.f32 %v4218_v29, %v4218_v29  ;;  %v3394_v34 = vld [vmem:[%s4000_s17 + $0x134] ss:$24 sps:$4 sm:$0xff]  }
 0xb84   : > { %2175 = vmatprep.subr.bf16.mxu0 %v3394_v34  ;;  %v2087_v34 = vsub.s32 4, %v4049_v38 }
 0xb85   : > { %v4224_v31 = vadd.f32 %v2042_v25, %v2038_v54  ;;  %2176 = vmatpush1.bf16.msra.mxu0 %v3392_v37  ;;  %v3423_v54 = vld [vmem:[%s4006_s16 + $0x50] sm:$0xff]  }
 0xb86   : > { %2177 = vmatprep.subr.bf16.mxu0 %v3397_v39  ;;  %3009 = vmatprep.subr.bf16.mxu1 %v3423_v54  ;;  %v2092_v39 = vrot.slane %v4052_v40, %v2087_v34 }
 0xb87   : > { %2054 = vadd.xlane.f32.xlu0 %v2052_v30  ;;  %v2053_v33 = vmul.f32 %v4224_v31, %v4224_v31  ;;  %v3424_v30 = vld [vmem:[%s4006_s16 + $0x10] sm:$0xff]  }
 0xb88   : > { %3010 = vmatpush3.bf16.msra.mxu1 %v3424_v30 }
 0xb89   : > { %2178 = vmatpush1.bf16.msra.mxu0 %v3395_v42  ;;  %v2088_v42 = vrot.slane %v4060_v44, %v2087_v34 }
 0xb8a   : > { %2179 = vmatprep.subr.bf16.mxu0 %v3400_v45 }
 0xb8b   : > { %2047 = vadd.xlane.f32.xlu0 %v4224_v31 }
 0xb8d   : > { %2180 = vmatpush1.bf16.msra.mxu0 %v3398_v43 }
 0xb8e   : > { %2181 = vmatprep.subr.bf16.mxu0 %v3403_v46 }
 0xb8f   : > { %2056 = vadd.xlane.f32.xlu0 %v2053_v33  ;;  %v3425_v33 = vld [vmem:[%s4006_s16 + $0x48] sm:$0xff]  }
 0xb90   : > { %3011 = vmatprep.subr.bf16.mxu1 %v3425_v33 }
 0xb91   : > { %2182 = vmatpush1.bf16.msra.mxu0 %v3401_v47  ;;  %3012 = vmatpush3.bf16.msra.mxu1 %v3426_v32 }
 0xb92   : > { %2183 = vmatprep.subr.bf16.mxu0 %v3406_v48 }
 0xb95   : > { %2184 = vmatpush1.bf16.msra.mxu0 %v3404_v49 }
 0xb96   : > { %2185 = vmatprep.subr.bf16.mxu0 %v3409_v52 }
 0xb99   : > { %2186 = vmatpush1.bf16.msra.mxu0 %v3407_v55 }
 0xb9a   : > { %2187 = vmatprep.subr.bf16.mxu0 %v3412_v57 }
 0xb9d   : > { %2188 = vmatpush1.bf16.msra.mxu0 %v3410_v60 }
 0xc0c   : > { %v2046_v58 = vpop.xlane.xlu0 %2045 }
 0xc0d   : > { %v2050_v4 = vmul.f32 0.0078125, %v2046_v58 }
 0xc0f   : > { %v2060_v6 = vmul.f32 %v2050_v4, %v2050_v4  ;;  %v2064_v56 = vsub.f32 %v4218_v29, %v2050_v4 }
 0xc10   : > { %v2055_v5 = vpop.xlane.xlu0 %2054 }
 0xc11   : > { %v2058_v7 = vmul.f32 0.0078125, %v2055_v5 }
 0xc13   : > { %v2062_v8 = vsub.f32 %v2058_v7, %v2060_v6 }
 0xc14   : > { %v2048_v9 = vpop.xlane.xlu0 %2047 }
 0xc15   : > { %v2066_v10 = vadd.f32 1e-05, %v2062_v8  ;;  %v2051_v11 = vmul.f32 0.0078125, %v2048_v9 }
 0xc17   : > { %3461 = vrsqrt.f32 %v2066_v10  ;;  %v2061_v14 = vmul.f32 %v2051_v11, %v2051_v11  ;;  %v2065_v23 = vsub.f32 %v4224_v31, %v2051_v11  ;;  %v3427_v31 = vld [vmem:[%s4006_s16 + $0x40] sm:$0xff]  }
 0xc18   : > { %v2057_v13 = vpop.xlane.xlu0 %2056  ;;  %3013 = vmatprep.subr.bf16.mxu1 %v3427_v31 }
 0xc19   : > { %v2059_v15 = vmul.f32 0.0078125, %v2057_v13  ;;  %3014 = vmatpush3.bf16.msra.mxu1 %v3428_v35 }
 0xc1b   : > { %v2063_v16 = vsub.f32 %v2059_v15, %v2061_v14 }
 0xc1d   : > { %v2067_v19 = vadd.f32 1e-05, %v2063_v16 }
 0xc1f   : > { %3463 = vrsqrt.f32 %v2067_v19 }
 0xc24   : > { %v3462_v50 = vpop.eup %3461 }
 0xc25   : > { %v2070_v21 = vmul.f32 %v3462_v50, %v2064_v56 }
 0xc27   : > { %v2076_v26 = vmul.f32 %v2075_v53, %v2070_v21 }
 0xc29   : > { %v2082_v28 = vadd.f32 %v2081_v18, %v2076_v26 }
 0xc2c   : > { %v3464_v24 = vpop.eup %3463 }
 0xc2d   : > { %v2071_v25 = vmul.f32 %v3464_v24, %v2065_v23  ;;  %v2425_v24 = vsub.s32 6, %v4049_v38 }
 0xc2f   : > { %v2077_v27 = vmul.f32 %v2075_v53, %v2071_v25  ;;  %v2431_v25 = vsub.s32 7, %v4049_v38 }
 0xc31   : > { %v2083_v29 = vadd.f32 %v2081_v18, %v2077_v27  ;;  %v2426_v18 = vrot.slane %v4060_v44, %v2425_v24 }
 0xc33   : > { %v2084_v51 = vpack.c.bf16 %v2083_v29, %v2082_v28 }
 0xc35   : > { %2206 = vmatmul.mubr.bf16.vlgmr.msra.gmra.mxu0 %v2084_v51 }
 0xcf5   : > { %v2207_v37 = vpop.f32.mrf.mxu0 }
 0xcf6   : > { %v2208_v48 = vadd.f32 %v2207_v37, %v2088_v42 }
 0xcf7   : > { %v2209_v43 = vpop.f32.mrf.mxu0 }
 0xcf8   : > { %v2210_v46 = vadd.f32 %v2209_v43, %v2092_v39  ;;  %v2216_v36 = vmax.f32 %v2208_v48, 0.0 }
 0xcf9   : > { %v2211_v45 = vpop.f32.mrf.mxu0 }
 0xcfa   : > { %v2212_v47 = vadd.f32 %v2211_v45, %v2088_v42  ;;  %v2217_v57 = vmax.f32 %v2210_v46, 0.0 }
 0xcfb   : > { %v2213_v49 = vpop.f32.mrf.mxu0 }
 0xcfc   : > { %v2214_v52 = vadd.f32 %v2213_v49, %v2092_v39  ;;  %v2218_v55 = vmax.f32 %v2212_v47, 0.0 }
 0xcfe   : > { %v2219_v60 = vmax.f32 %v2214_v52, 0.0  ;;  %v2220_v62 = vpack.c.bf16 %v2218_v55, %v2216_v36 }
 0xd00   : > { %v2221_v61 = vpack.c.bf16 %v2219_v60, %v2217_v57 }
 0xd02   : > { %2386 = vmatprep.mubr.bf16.mxu1 %v2221_v61 }
 0xd03   : > { %2387 = vmatmul.mubr.bf16.vlgmr.msra.gmra.mxu1 %v2220_v62 }
 0xdc3   : > { %v3015_v40 = vpop.f32.mrf.mxu1 }
 0xdc5   : > { %v3016_v0 = vpop.f32.mrf.mxu1 }
 0xdc6   : > { %v3017_v1 = vadd.f32 %v3016_v0, %v3015_v40 }
 0xdc7   : > { %v3018_v2 = vpop.f32.mrf.mxu1 }
 0xdc8   : > { %v2389_v17 = vadd.f32 %v3017_v1, %v2257_v63 }
 0xdc9   : > { %v3019_v3 = vpop.f32.mrf.mxu1 }
 0xdca   : > { %v3020_v58 = vadd.f32 %v3019_v3, %v3018_v2  ;;  %v2395_v4 = vadd.f32 %v2389_v17, %v2082_v28  ;;  %v2432_v28 = vrot.slane %v4060_v44, %v2431_v25 }
 0xdcc   : > { %v2392_v5 = vadd.f32 %v3020_v58, %v2257_v63  ;;  %2397 = vadd.xlane.f32.xlu1 %v2395_v4  ;;  %v2403_v6 = vmul.f32 %v2395_v4, %v2395_v4 }
 0xdce   : > { %2405 = vadd.xlane.f32.xlu0 %v2403_v6  ;;  %v2396_v7 = vadd.f32 %v2392_v5, %v2083_v29 }
 0xdd0   : > { %v2404_v8 = vmul.f32 %v2396_v7, %v2396_v7 }
 0xdd2   : > { %2399 = vadd.xlane.f32.xlu0 %v2396_v7 }
 0xdd6   : > { %2407 = vadd.xlane.f32.xlu0 %v2404_v8 }
 0xe55   : > { %v2398_v9 = vpop.xlane.xlu1 %2397 }
 0xe56   : > { %v2401_v10 = vmul.f32 0.0078125, %v2398_v9 }
 0xe57   : > { %v2406_v11 = vpop.xlane.xlu0 %2405 }
 0xe58   : > { %v2411_v13 = vmul.f32 %v2401_v10, %v2401_v10  ;;  %v2409_v14 = vmul.f32 0.0078125, %v2406_v11  ;;  %v2415_v26 = vsub.f32 %v2395_v4, %v2401_v10 }
 0xe5a   : > { %v2413_v15 = vsub.f32 %v2409_v14, %v2411_v13 }
 0xe5b   : > { %v2400_v16 = vpop.xlane.xlu0 %2399 }
 0xe5c   : > { %v2417_v19 = vadd.f32 1e-05, %v2413_v15  ;;  %v2402_v50 = vmul.f32 0.0078125, %v2400_v16 }
 0xe5e   : > { %3465 = vrsqrt.f32 %v2417_v19  ;;  %v2412_v21 = vmul.f32 %v2402_v50, %v2402_v50  ;;  %v2416_v30 = vsub.f32 %v2396_v7, %v2402_v50 }
 0xe5f   : > { %v2408_v56 = vpop.xlane.xlu0 %2407 }
 0xe60   : > { %v2410_v53 = vmul.f32 0.0078125, %v2408_v56 }
 0xe62   : > { %v2414_v59 = vsub.f32 %v2410_v53, %v2412_v21 }
 0xe64   : > { %v2418_v23 = vadd.f32 1e-05, %v2414_v59 }
 0xe66   : > { %3467 = vrsqrt.f32 %v2418_v23 }
 0xe6b   : > { %v3466_v27 = vpop.eup %3465 }
 0xe6c   : > { %v2421_v29 = vmul.f32 %v3466_v27, %v2415_v26 }
 0xe6e   : > { %v2427_v51 = vmul.f32 %v2426_v18, %v2421_v29 }
 0xe70   : > { %v2433_v54 = vadd.f32 %v2432_v28, %v2427_v51 }
 0xe72   : > { %2435 = vst [vmem:[#allocation2] sm:$0xff] %v2433_v54 }
 0xe73   : > { %v3468_v33 = vpop.eup %3467 }
 0xe74   : > { %v2422_v32 = vmul.f32 %v3468_v33, %v2416_v30 }
 0xe76   : > { %v2428_v31 = vmul.f32 %v2426_v18, %v2422_v32  ;;  %2440 = sbr.rel (%p2882_p13) target bundleno = 4078 (0xfee), region = 88 }
 0xe78   : > { %v2434_v35 = vadd.f32 %v2432_v28, %v2428_v31 }
 0xe7a   : > { %2436 = vst [vmem:[#allocation2 + $0x8] sm:$0xff] %v2434_v35 }
 0xe7b   : > { %vm2442_vm8 = vcmask 1041408   ;;  %v2447_v34 = vmul.f32 %v2433_v54, %v2433_v54  ;;  %v3469_v44 = vld [vmem:[#allocation14 + $0x38] sm:$0xff]   ;;  %v3783_v42 = vmov 0.0   ;;  %v3470_v43 = vld [vmem:[#allocation14 + $0x30] sm:$0xff]   ;;  %v3471_v45 = vld [vmem:[#allocation14 + $0x28] sm:$0xff]   ;;  %vm3784_vm9 = vmmov 0  }
 0xe7c   : > { %v2443_v37 = vsel %vm2442_vm8, %v2433_v54, 0.0  ;;  %3130 = vmatprep.subr.bf16.mxu0 %v3783_v42  ;;  %v3472_v46 = vld [vmem:[#allocation14 + $0x20] sm:$0xff]   ;;  %3146 = vmatprep.mubr.msk.bf16.mxu0 %vm3784_vm9, %v3783_v42  ;;  %v3473_v47 = vld [vmem:[#allocation14 + $0x18] sm:$0xff]   ;;  %v3474_v48 = vld [vmem:[#allocation14 + $0x10] sm:$0xff]  }
 0xe7d   : > { %2444 = vadd.xlane.f32.xlu0 %v2443_v37  ;;  %v2448_v39 = vsel %vm2442_vm8, %v2447_v34, 0.0  ;;  %3131 = vmatpush3.bf16.msra.mxu0 %v3469_v44  ;;  %v3475_v49 = vld [vmem:[#allocation14 + $0x8] sm:$0xff]   ;;  %v3476_v52 = vld [vmem:[#allocation14] sm:$0xff]  }
 0xe7e   : > { %3132 = vmatprep.subr.bf16.mxu0 %v3783_v42  ;;  %v2441_v40 = vld [vmem:[%s4323_s6] sm:$0xff] }
 0xe7f   : > { %v2461_v0 = vrot.slane %v2441_v40, %v4055_v41  ;;  %v2466_v17 = vrot.slane %v2441_v40, %v2041_v22  ;;  %v2488_v5 = vrot.slane %v2441_v40, %v2074_v20 }
 0xe81   : > { %2449 = vadd.xlane.f32.xlu0 %v2448_v39  ;;  %3133 = vmatpush3.bf16.msra.mxu0 %v3470_v43 }
 0xe82   : > { %3134 = vmatprep.subr.bf16.mxu0 %v3783_v42 }
 0xe85   : > { %3135 = vmatpush3.bf16.msra.mxu0 %v3471_v45 }
 0xe86   : > { %3136 = vmatprep.subr.bf16.mxu0 %v3783_v42 }
 0xe89   : > { %3137 = vmatpush3.bf16.msra.mxu0 %v3472_v46 }
 0xe8a   : > { %3138 = vmatprep.subr.bf16.mxu0 %v3783_v42 }
 0xe8d   : > { %3139 = vmatpush3.bf16.msra.mxu0 %v3473_v47 }
 0xe8e   : > { %3140 = vmatprep.subr.bf16.mxu0 %v3783_v42 }
 0xe91   : > { %3141 = vmatpush3.bf16.msra.mxu0 %v3474_v48 }
 0xe92   : > { %3142 = vmatprep.subr.bf16.mxu0 %v3783_v42 }
 0xe95   : > { %3143 = vmatpush3.bf16.msra.mxu0 %v3475_v49 }
 0xe96   : > { %3144 = vmatprep.subr.bf16.mxu0 %v3783_v42 }
 0xe99   : > { %3145 = vmatpush3.bf16.msra.mxu0 %v3476_v52 }
 0xf06   : > { %v2445_v55 = vpop.xlane.xlu0 %2444 }
 0xf07   : > { %v2446_v57 = vmul.f32 0.0078125, %v2445_v55 }
 0xf09   : > { %v2452_v36 = vmul.f32 %v2446_v57, %v2446_v57  ;;  %v2454_v63 = vsub.f32 %v2433_v54, %v2446_v57 }
 0xf0a   : > { %v2450_v60 = vpop.xlane.xlu0 %2449 }
 0xf0b   : > { %v2451_v61 = vmul.f32 0.0078125, %v2450_v60 }
 0xf0d   : > { %v2453_v62 = vsub.f32 %v2451_v61, %v2452_v36 }
 0xf0f   : > { %v2455_v12 = vadd.f32 1e-05, %v2453_v62 }
 0xf11   : > { %3477 = vrsqrt.f32 %v2455_v12 }
 0xf1e   : > { %v3478_v1 = vpop.eup %3477 }
 0xf1f   : > { %v2457_v2 = vmul.f32 %v3478_v1, %v2454_v63 }
 0xf21   : > { %v2462_v3 = vmul.f32 %v2461_v0, %v2457_v2 }
 0xf23   : > { %v2467_v58 = vadd.f32 %v2466_v17, %v2462_v3 }
 0xf25   : > { %v2468_v4 = vpack.c.bf16 %v2467_v58, %v2467_v58 }
 0xf27   : > { %3147 = vmatmul.mubr.bf16.vlgmr.msra.gmra.mxu0 %v2468_v4 }
 0xfe7   : > { %v2571_v6 = vpop.f32.mrf.mxu0 }
 0xfe8   : > { %v2572_v7 = vadd.f32 %v2571_v6, %v2488_v5 }
 0xfe9   : > { %v3148_v8 = vpop.f32.mrf.mxu0 }
 0xfea   : > { %2577 = vst [vmem:[#allocation15] sm:$0x3] %v2572_v7 }
 0xfeb   : > { %v2574_v9 = vpop.f32.mrf.mxu0 }
 0xfed   : > { %v3149_v10 = vpop.f32.mrf.mxu0 }
 0xfee PF: > { %p3214_p0 = scmp.eq.s32.totalorder %s3860_s11, 1  ;;  %s3785_s0 = smov [#allocation15]  }
 0xfef   : > { %s2587_s15 = sshll.u32 %s3785_s0, 4  ;;  %s2588_s15 = int_to_ptr.vmem [resolvable:$true] %s2587_s15 }
 0xff0   : > { %s3667_s24 = scalar_lea.vmem %s2588_s15, 32  ;;  %p3674_p12 = scmp.lt.s32.totalorder %s2588_s15, %s2588_s15 }
 0xff1   : > { %p3668_p1 = scmp.ne.s32.totalorder %s2588_s15, %s3667_s24  ;;  %p3675_p7 = scmp.lt.s32.totalorder %s3667_s24, %s3667_s24 }
 0xff3   : > { %p3669_p5 = pnand %p3668_p1, %p3214_p0  ;;  %p3676_p11 = por %p3675_p7, %p3674_p12 }
 0xff5   : > { %p3670_p8 = pneg %p3669_p5 }
 0xff7   : > { %p3677_p2 = pnand %p3676_p11, %p3670_p8 }
 0xff9   : > { %3680 = shalt.err (!%p3677_p2)
}
 0xffa   : > { %3179 = dma.vmem_to_hbm [thread:$0]  (%p3214_p0), %s2588_s15, 32, %s4325_s8, [#allocation5]  }
 0xffb   : > { %3736 = dma.done.wait (%p3214_p0), [#allocation5], 32  }
 0xffc   : > { %3738 = vsyncadd (%p3214_p0), [#allocation5], 4294967264 }
 0xffd PF: > { %s27_s10 = sadd.s32 1, %s3761_s10   ;;  %s4366_s1 = sld [smem:[#allocation23_spill]] }
 0xffe   : > { %p24_p3 = scmp.ge.s32.totalorder %s27_s10, 4   ;;  %s4367_s2 = sld [smem:[#allocation22_spill]] }
 0xfff   : > { %s4368_s27 = smov %s3745_s28  ;;  %s4369_s28 = smov %s3749_s29 }
0x1000   : > { %s4371_s30 = smov %s3757_s9  ;;  %26 = sbr.rel (!%p24_p3) target bundleno = 14 (0xe), region = 140 }
0x1003   : > { %s4370_s29 = smov %s4366_s1 }
0x1004   : > { %s4372_s9 = smov %s4367_s2 }
0x1005   :  { %2600 = vsyncpa [#allocation4], 1 }
0x1006   :  { %2602 = vsyncpa [#allocation4 + $0x1], 1 }
0x1007   :  { %2603 = vsyncpa [#allocation7], 1 }
0x1008   :  { %2604 = vsyncpa [#allocation10], 1 }
0x1009   :  { %2606 = vsyncpa [#allocation10 + $0x1], 1 }
0x100a   :  { %2607 = vsyncpa [#allocation13], 1 }
0x100b   :  { %2609 = vsyncpa [#allocation13 + $0x1], 1 }
0x100c   :  { %2610 = vsyncpa [#allocation5], 1 }
0x100d   :  { %2612 = vsyncpa [#allocation5 + $0x1], 1 }

</bundles_post_ra>
